<compile_context>
chip_gen: v5e
topology: v5e:2x2
jax: 0.10.0
libtpu: 0.0.40
codegen_flags: <defaults>
</compile_context>

<pallas_src>
import jax
import jax.numpy as jnp
from jax.experimental import pallas as pl
from jax.experimental.pallas import tpu as pltpu

INPUT_SIZE = 129 * 40          # 5160
H1, H2, OUT = 64, 32, 2
TB_F32 = 512                   # batch rows / grid step when x arrives as f32
TB_BF16 = 1024                 # batch rows / grid step when x arrives as bf16


def _round_up(n, m):
    return -(-n // m) * m


def mlp_kernel(x_ref, w1_ref, b1_ref, w2_ref, b2_ref, w3_ref, b3_ref, o_ref):
    # fc1: cast the streamed tile to bf16 in-kernel (no-op if already bf16),
    # MXU matmul with f32 accumulation, ReLU on the VPU.
    x_bf = x_ref[...].astype(jnp.bfloat16)
    h1 = jnp.dot(x_bf, w1_ref[...], preferred_element_type=jnp.float32)
    h1 = jnp.maximum(h1 + b1_ref[...], 0.0)
    # fc2 / fc3 are tiny and stay fully f32.
    h2 = jnp.dot(h1, w2_ref[...], preferred_element_type=jnp.float32)
    h2 = jnp.maximum(h2 + b2_ref[...], 0.0)
    o_ref[...] = jnp.dot(h2, w3_ref[...], preferred_element_type=jnp.float32) + b3_ref[...]


def _pick_tb(b, tb_max):
    if b <= 16:
        # Single tile; block dims equal to full array dims are always legal.
        return b
    # >= 2 grid steps (feeds both TensorCores on v7x), rows a multiple of 8.
    return max(8, min(tb_max, _round_up(pl.cdiv(b, 2), 8)))


def net_forward(x, params):
    """x: (B, 129, 40) float32 (or bfloat16) -> (B, 2) float32."""
    w1, b1, w2, b2, w3, b3 = params          # w1: (5160, 64) bf16, rest f32
    b = x.shape[0]

    # Flatten exactly like torch .view(B, -1); no pad, no cast (done in-kernel).
    x_flat = x.reshape(b, -1)

    tb_max = TB_BF16 if x_flat.dtype == jnp.bfloat16 else TB_F32
    tb = _pick_tb(b, tb_max)
    num_tiles = pl.cdiv(b, tb)               # ragged last tile handled by Pallas

    const = lambda shape: pl.BlockSpec(shape, lambda i: (0, 0))

    out = pl.pallas_call(
        mlp_kernel,
        out_shape=jax.ShapeDtypeStruct((b, OUT), jnp.float32),
        grid=(num_tiles,),
        in_specs=[
            pl.BlockSpec((tb, INPUT_SIZE), lambda i: (i, 0)),   # x: batch-tiled stream
            const((INPUT_SIZE, H1)), const((1, H1)),            # fc1: VMEM-resident
            const((H1, H2)),         const((1, H2)),            # fc2: VMEM-resident
            const((H2, OUT)),        const((1, OUT)),           # fc3: VMEM-resident
        ],
        out_specs=pl.BlockSpec((tb, OUT), lambda i: (i, 0)),
        compiler_params=pltpu.CompilerParams(
            dimension_semantics=("parallel",),        # megacore split on v7x
            vmem_limit_bytes=32 * 1024 * 1024,        # cover TB=512 f32 double-buffer on v5e
        ),
    )(x_flat, w1, b1, w2, b2, w3, b3)
    return out


def init_params(key):
    """Deterministic init mimicking PyTorch Linear default (uniform +/- 1/sqrt(fan_in))."""
    def linear(key, fan_in, fan_out):
        kw, kb = jax.random.split(key)
        bound = 1.0 / jnp.sqrt(float(fan_in))
        w = jax.random.uniform(kw, (fan_in, fan_out), jnp.float32, -bound, bound)
        bias = jax.random.uniform(kb, (1, fan_out), jnp.float32, -bound, bound)
        return w, bias

    k1, k2, k3 = jax.random.split(key, 3)
    w1_f32, b1 = linear(k1, INPUT_SIZE, H1)
    w2, b2 = linear(k2, H1, H2)
    w3, b3 = linear(k3, H2, OUT)
    # W1 dominates the weight stream -> store in bf16 (un-padded); the rest stays f32.
    w1 = w1_f32.astype(jnp.bfloat16)
    return (w1, b1, w2, b2, w3, b3)


if __name__ == "__main__":
    key = jax.random.PRNGKey(0)
    kx, kp = jax.random.split(key)

    batch = 2
    x = jax.random.normal(kx, (batch, 129, 40), jnp.float32)
    params = init_params(kp)

    out = jax.block_until_ready(net_forward(x, params))

    # Pure-JAX reference using the same bf16 rounding on the fc1 operands.
    w1, b1, w2, b2, w3, b3 = params
    xf = x.reshape(batch, -1).astype(jnp.bfloat16).astype(jnp.float32)
    w1f = w1.astype(jnp.float32)
    ref = jnp.maximum(xf @ w1f + b1, 0.0)
    ref = jnp.maximum(ref @ w2 + b2, 0.0)
    ref = ref @ w3 + b3

    assert out.shape == (batch, OUT)
    assert jnp.allclose(out, ref, atol=1e-2, rtol=1e-2), (out, ref)

    print("KERNEL_OK")
</pallas_src>

<mosaic_0001>
module attributes {stable_mosaic.version = 11 : i64} {
  func.func @mlp_kernel(%arg0: i32, %arg1: memref<2x5160xf32, #tpu.memory_space<vmem>>, %arg2: memref<5160x64xbf16, #tpu.memory_space<vmem>>, %arg3: memref<1x64xf32, #tpu.memory_space<vmem>>, %arg4: memref<64x32xf32, #tpu.memory_space<vmem>>, %arg5: memref<1x32xf32, #tpu.memory_space<vmem>>, %arg6: memref<32x2xf32, #tpu.memory_space<vmem>>, %arg7: memref<1x2xf32, #tpu.memory_space<vmem>>, %arg8: memref<2x2xf32, #tpu.memory_space<vmem>>) attributes {dimension_semantics = [#tpu.dimension_semantics<parallel>], iteration_bounds = array<i64: 1>, scalar_prefetch = 0 : i64, scratch_operands = 0 : i64, tpu.core_type = #tpu.core_type<tc>, window_params = [{transform_indices = @transform_0, window_bounds = array<i64: 2, 5160>}, {pipeline_mode = #tpu.pipeline_mode<synchronous>, transform_indices = @transform_1, window_bounds = array<i64: 5160, 64>}, {pipeline_mode = #tpu.pipeline_mode<synchronous>, transform_indices = @transform_2, window_bounds = array<i64: 1, 64>}, {pipeline_mode = #tpu.pipeline_mode<synchronous>, transform_indices = @transform_3, window_bounds = array<i64: 64, 32>}, {pipeline_mode = #tpu.pipeline_mode<synchronous>, transform_indices = @transform_4, window_bounds = array<i64: 1, 32>}, {pipeline_mode = #tpu.pipeline_mode<synchronous>, transform_indices = @transform_5, window_bounds = array<i64: 32, 2>}, {pipeline_mode = #tpu.pipeline_mode<synchronous>, transform_indices = @transform_6, window_bounds = array<i64: 1, 2>}, {transform_indices = @transform_7, window_bounds = array<i64: 2, 2>}]} {
    %c0 = arith.constant 0 : index
    %c0_0 = arith.constant 0 : index
    %0 = vector.load %arg1[%c0, %c0_0] : memref<2x5160xf32, #tpu.memory_space<vmem>>, vector<2x5160xf32>
    %1 = arith.truncf %0 : vector<2x5160xf32> to vector<2x5160xbf16>
    %c0_1 = arith.constant 0 : index
    %c0_2 = arith.constant 0 : index
    %2 = vector.load %arg2[%c0_1, %c0_2] : memref<5160x64xbf16, #tpu.memory_space<vmem>>, vector<5160x64xbf16>
    %cst = arith.constant dense<0.000000e+00> : vector<2x64xf32>
    %3 = tpu.matmul %1, %2, %cst {dimension_numbers = #tpu.dot_dimension_numbers<[1], [0], [0], [1], [0, 0, 1, 1], [], []>} : vector<2x5160xbf16>, vector<5160x64xbf16>, vector<2x64xf32> -> vector<2x64xf32>
    %c0_3 = arith.constant 0 : index
    %c0_4 = arith.constant 0 : index
    %4 = vector.load %arg3[%c0_3, %c0_4] : memref<1x64xf32, #tpu.memory_space<vmem>>, vector<1x64xf32>
    %5 = vector.broadcast %4 : vector<1x64xf32> to vector<2x64xf32>
    %6 = arith.addf %3, %5 : vector<2x64xf32>
    %cst_5 = arith.constant 0.000000e+00 : f32
    %7 = vector.broadcast %cst_5 : f32 to vector<2x64xf32>
    %8 = arith.maximumf %6, %7 : vector<2x64xf32>
    %c0_6 = arith.constant 0 : index
    %c0_7 = arith.constant 0 : index
    %9 = vector.load %arg4[%c0_6, %c0_7] : memref<64x32xf32, #tpu.memory_space<vmem>>, vector<64x32xf32>
    %cst_8 = arith.constant dense<0.000000e+00> : vector<2x32xf32>
    %10 = tpu.matmul %8, %9, %cst_8 {dimension_numbers = #tpu.dot_dimension_numbers<[1], [0], [0], [1], [0, 0, 1, 1], [], []>} : vector<2x64xf32>, vector<64x32xf32>, vector<2x32xf32> -> vector<2x32xf32>
    %c0_9 = arith.constant 0 : index
    %c0_10 = arith.constant 0 : index
    %11 = vector.load %arg5[%c0_9, %c0_10] : memref<1x32xf32, #tpu.memory_space<vmem>>, vector<1x32xf32>
    %12 = vector.broadcast %11 : vector<1x32xf32> to vector<2x32xf32>
    %13 = arith.addf %10, %12 : vector<2x32xf32>
    %cst_11 = arith.constant 0.000000e+00 : f32
    %14 = vector.broadcast %cst_11 : f32 to vector<2x32xf32>
    %15 = arith.maximumf %13, %14 : vector<2x32xf32>
    %c0_12 = arith.constant 0 : index
    %c0_13 = arith.constant 0 : index
    %16 = vector.load %arg6[%c0_12, %c0_13] : memref<32x2xf32, #tpu.memory_space<vmem>>, vector<32x2xf32>
    %cst_14 = arith.constant dense<0.000000e+00> : vector<2x2xf32>
    %17 = tpu.matmul %15, %16, %cst_14 {dimension_numbers = #tpu.dot_dimension_numbers<[1], [0], [0], [1], [0, 0, 1, 1], [], []>} : vector<2x32xf32>, vector<32x2xf32>, vector<2x2xf32> -> vector<2x2xf32>
    %c0_15 = arith.constant 0 : index
    %c0_16 = arith.constant 0 : index
    %18 = vector.load %arg7[%c0_15, %c0_16] : memref<1x2xf32, #tpu.memory_space<vmem>>, vector<1x2xf32>
    %19 = vector.broadcast %18 : vector<1x2xf32> to vector<2x2xf32>
    %20 = arith.addf %17, %19 : vector<2x2xf32>
    %c0_17 = arith.constant 0 : index
    %c0_18 = arith.constant 0 : index
    %21 = vector.load %arg8[%c0_17, %c0_18] : memref<2x2xf32, #tpu.memory_space<vmem>>, vector<2x2xf32>
    tpu.vector_store %arg8[%c0_17, %c0_18], %20 {strides = array<i32>} : memref<2x2xf32, #tpu.memory_space<vmem>>, vector<2x2xf32>,
    return
  }
  func.func @transform_0(%arg0: i32) -> (i32, i32) {
    %c0_i32 = arith.constant 0 : i32
    %c0_i32_0 = arith.constant 0 : i32
    return %arg0, %c0_i32 : i32, i32
  }
  func.func @transform_1(%arg0: i32) -> (i32, i32) {
    %c0_i32 = arith.constant 0 : i32
    %c0_i32_0 = arith.constant 0 : i32
    %c0_i32_1 = arith.constant 0 : i32
    return %c0_i32, %c0_i32_0 : i32, i32
  }
  func.func @transform_2(%arg0: i32) -> (i32, i32) {
    %c0_i32 = arith.constant 0 : i32
    %c0_i32_0 = arith.constant 0 : i32
    %c0_i32_1 = arith.constant 0 : i32
    return %c0_i32, %c0_i32_0 : i32, i32
  }
  func.func @transform_3(%arg0: i32) -> (i32, i32) {
    %c0_i32 = arith.constant 0 : i32
    %c0_i32_0 = arith.constant 0 : i32
    %c0_i32_1 = arith.constant 0 : i32
    return %c0_i32, %c0_i32_0 : i32, i32
  }
  func.func @transform_4(%arg0: i32) -> (i32, i32) {
    %c0_i32 = arith.constant 0 : i32
    %c0_i32_0 = arith.constant 0 : i32
    %c0_i32_1 = arith.constant 0 : i32
    return %c0_i32, %c0_i32_0 : i32, i32
  }
  func.func @transform_5(%arg0: i32) -> (i32, i32) {
    %c0_i32 = arith.constant 0 : i32
    %c0_i32_0 = arith.constant 0 : i32
    %c0_i32_1 = arith.constant 0 : i32
    return %c0_i32, %c0_i32_0 : i32, i32
  }
  func.func @transform_6(%arg0: i32) -> (i32, i32) {
    %c0_i32 = arith.constant 0 : i32
    %c0_i32_0 = arith.constant 0 : i32
    %c0_i32_1 = arith.constant 0 : i32
    return %c0_i32, %c0_i32_0 : i32, i32
  }
  func.func @transform_7(%arg0: i32) -> (i32, i32) {
    %c0_i32 = arith.constant 0 : i32
    %c0_i32_0 = arith.constant 0 : i32
    return %arg0, %c0_i32 : i32, i32
  }
}

</mosaic_0001>

<bundles_post_ra>
// kernel: tpu_custom_call.1
= control target key start
LH: loop header
LB: loop body
LE: loop exit
PB: predicated region body
PF: predicated region fallthrough
CT: control target
= control target key end

     0   :  { %s6192_s0 = inlined_call_operand.vmem [shape: f32[2,5160], index: 0, kind: input, shape index: {}]   ;;  %s6193_s1 = inlined_call_operand.vmem [shape: bf16[5160,64], index: 1, kind: input, shape index: {}]   ;;  %s6194_s2 = inlined_call_operand.vmem [shape: f32[1,64], index: 2, kind: input, shape index: {}]   ;;  %s6195_s3 = inlined_call_operand.vmem [shape: f32[64,32], index: 3, kind: input, shape index: {}]   ;;  %s6196_s4 = inlined_call_operand.vmem [shape: f32[1,32], index: 4, kind: input, shape index: {}]   ;;  %s6197_s5 = inlined_call_operand.vmem [shape: f32[32,2], index: 5, kind: input, shape index: {}]   ;;  %s6198_s6 = inlined_call_operand.vmem [shape: f32[1,2], index: 6, kind: input, shape index: {}]   ;;  %s6199_s7 = inlined_call_operand.hbm [shape: f32[2,2], index: 7, kind: output, shape index: {}]  }
   0x1   :  { %v4696_v0 = vld [vmem:[%s6193_s1 + $0x38] sm:$0xff]  ;;  %v4695_v4 = vld [vmem:[%s6193_s1 + $0x30] sm:$0xff]  ;;  %v4694_v8 = vld [vmem:[%s6193_s1 + $0x28] sm:$0xff] }
   0x2   :  { %v4712_v1 = vld [vmem:[%s6193_s1 + $0xb8] sm:$0xff]  ;;  %2777 = vmatpush.bf16.msra.mxu0 %v4696_v0  ;;  %v4711_v5 = vld [vmem:[%s6193_s1 + $0xb0] sm:$0xff]  ;;  %v4710_v9 = vld [vmem:[%s6193_s1 + $0xa8] sm:$0xff] }
   0x3   :  { %v4720_v2 = vld [vmem:[%s6193_s1 + $0xf8] sm:$0xff]  ;;  %2803 = vmatpush.bf16.msra.mxu2 %v4712_v1  ;;  %v4719_v6 = vld [vmem:[%s6193_s1 + $0xf0] sm:$0xff]  ;;  %v4718_v10 = vld [vmem:[%s6193_s1 + $0xe8] sm:$0xff] }
   0x4   :  { %v4704_v3 = vld [vmem:[%s6193_s1 + $0x78] sm:$0xff]  ;;  %2816 = vmatpush.bf16.msra.mxu3 %v4720_v2  ;;  %v4703_v7 = vld [vmem:[%s6193_s1 + $0x70] sm:$0xff]  ;;  %v4702_v11 = vld [vmem:[%s6193_s1 + $0x68] sm:$0xff] }
   0x5   :  { %2790 = vmatpush.bf16.msra.mxu1 %v4704_v3  ;;  %v4693_v12 = vld [vmem:[%s6193_s1 + $0x20] sm:$0xff]  ;;  %v4692_v16 = vld [vmem:[%s6193_s1 + $0x18] sm:$0xff]  ;;  %v4691_v20 = vld [vmem:[%s6193_s1 + $0x10] sm:$0xff] }
   0x6   :  { %2778 = vmatpush.bf16.msra.mxu0 %v4695_v4  ;;  %v4709_v13 = vld [vmem:[%s6193_s1 + $0xa0] sm:$0xff]  ;;  %v4708_v17 = vld [vmem:[%s6193_s1 + $0x98] sm:$0xff]  ;;  %v4707_v22 = vld [vmem:[%s6193_s1 + $0x90] sm:$0xff] }
   0x7   :  { %2804 = vmatpush.bf16.msra.mxu2 %v4711_v5  ;;  %v4717_v14 = vld [vmem:[%s6193_s1 + $0xe0] sm:$0xff]  ;;  %v4716_v18 = vld [vmem:[%s6193_s1 + $0xd8] sm:$0xff]  ;;  %v4715_v23 = vld [vmem:[%s6193_s1 + $0xd0] sm:$0xff] }
   0x8   :  { %2817 = vmatpush.bf16.msra.mxu3 %v4719_v6  ;;  %v4701_v15 = vld [vmem:[%s6193_s1 + $0x60] sm:$0xff]  ;;  %v4700_v19 = vld [vmem:[%s6193_s1 + $0x58] sm:$0xff]  ;;  %v4699_v24 = vld [vmem:[%s6193_s1 + $0x50] sm:$0xff] }
   0x9   :  { %2791 = vmatpush.bf16.msra.mxu1 %v4703_v7  ;;  %v28_v21 = vld [vmem:[%s6192_s0] sm:$0xff] }
   0xa   :  { %2779 = vmatpush.bf16.msra.mxu0 %v4694_v8  ;;  %50 = vst [vmem:[#allocation1] ss:$4 sm:$0xff] %v28_v21 }
   0xb   :  { %2805 = vmatpush.bf16.msra.mxu2 %v4710_v9 }
   0xc   :  { %2818 = vmatpush.bf16.msra.mxu3 %v4718_v10 }
   0xd   :  { %2792 = vmatpush.bf16.msra.mxu1 %v4702_v11 }
   0xe   :  { %2780 = vmatpush.bf16.msra.mxu0 %v4693_v12 }
   0xf   :  { %2806 = vmatpush.bf16.msra.mxu2 %v4709_v13 }
  0x10   :  { %2819 = vmatpush.bf16.msra.mxu3 %v4717_v14 }
  0x11   :  { %2793 = vmatpush.bf16.msra.mxu1 %v4701_v15 }
  0x12   :  { %2781 = vmatpush.bf16.msra.mxu0 %v4692_v16 }
  0x13   :  { %2807 = vmatpush.bf16.msra.mxu2 %v4708_v17 }
  0x14   :  { %2820 = vmatpush.bf16.msra.mxu3 %v4716_v18 }
  0x15   :  { %2794 = vmatpush.bf16.msra.mxu1 %v4700_v19 }
  0x16   :  { %12 = vsyncpa [#allocation3], 0  ;;  %2782 = vmatpush.bf16.msra.mxu0 %v4691_v20  ;;  %v4690_v25 = vld [vmem:[%s6193_s1 + $0x8] sm:$0xff]  ;;  %v4689_v29 = vld [vmem:[%s6193_s1] sm:$0xff]  ;;  %vm2773_vm0 = vcmask 1043456   ;;  %vm2769_vm1 = vcmask 326656  }
  0x17   :  { %2808 = vmatpush.bf16.msra.mxu2 %v4707_v22  ;;  %v4706_v26 = vld [vmem:[%s6193_s1 + $0x88] sm:$0xff]  ;;  %v4705_v30 = vld [vmem:[%s6193_s1 + $0x80] sm:$0xff]  ;;  %v30_v31 = vld [vmem:[%s6192_s0 + $0x10] sm:$0xff]  ;;  %vm3323_vm2 = vcmask 523264   ;;  %vm3356_vm3 = vcmask 261120   ;;  %s5041_s12 = smov [#allocation2]  }
  0x18   :  { %2821 = vmatpush.bf16.msra.mxu3 %v4715_v23  ;;  %v4714_v27 = vld [vmem:[%s6193_s1 + $0xc8] sm:$0xff]  ;;  %v55_v32 = vld.sshfl [vmem:[#allocation1 + $0x10] sm:$0xff pattern:$0x73625140]  ;;  %v4713_v36 = vld [vmem:[%s6193_s1 + $0xc0] sm:$0xff]  ;;  %s3387_s13 = sshll.u32 %s5041_s12, 4  ;;  %s3388_s13 = int_to_ptr.vmem [resolvable:$true] %s3387_s13 }
  0x19   :  { %2795 = vmatpush.bf16.msra.mxu1 %v4699_v24  ;;  %v4698_v28 = vld [vmem:[%s6193_s1 + $0x48] sm:$0xff]  ;;  %v53_v33 = vld.sshfl [vmem:[#allocation1] sm:$0xff pattern:$0x73625140]  ;;  %v4728_v37 = vld [vmem:[%s6193_s1 + $0x138] sm:$0xff]  ;;  %v146_v41 = vpack.c.bf16 %v55_v32, %v55_v32  ;;  %vm3380_vm4 = vcmask 9216  }
  0x1a   :  { %2783 = vmatpush.bf16.msra.mxu0 %v4690_v25  ;;  %v56_v34 = vld.sshfl [vmem:[#allocation1 + $0x18] sm:$0xff pattern:$0x73625140]  ;;  %v54_v35 = vld.sshfl [vmem:[#allocation1 + $0x8] sm:$0xff pattern:$0x73625140]  ;;  %v144_v44 = vpack.c.bf16 %v53_v33, %v53_v33 }
  0x1b   :  { %2809 = vmatpush.bf16.msra.mxu2 %v4706_v26  ;;  %61 = vst [vmem:[#allocation1] ss:$4 sm:$0xff] %v30_v31  ;;  %v4744_v38 = vld [vmem:[%s6193_s1 + $0x1b8] sm:$0xff]  ;;  %v4697_v40 = vld [vmem:[%s6193_s1 + $0x40] sm:$0xff]  ;;  %v29_v42 = vld [vmem:[%s6192_s0 + $0x8] sm:$0xff]  ;;  %v147_v46 = vpack.c.bf16 %v56_v34, %v56_v34  ;;  %v145_v49 = vpack.c.bf16 %v54_v35, %v54_v35 }
  0x1c   :  { %2822 = vmatpush.bf16.msra.mxu3 %v4714_v27  ;;  %v4752_v39 = vld [vmem:[%s6193_s1 + $0x1f8] sm:$0xff]  ;;  %52 = vst [vmem:[#allocation1 + $0x20] ss:$4 sm:$0xff] %v29_v42  ;;  %v4727_v45 = vld [vmem:[%s6193_s1 + $0x130] sm:$0xff]  ;;  %v4726_v51 = vld [vmem:[%s6193_s1 + $0x128] sm:$0xff] }
  0x1d   :  { %2796 = vmatpush.bf16.msra.mxu1 %v4698_v28  ;;  %v4736_v43 = vld [vmem:[%s6193_s1 + $0x178] sm:$0xff]  ;;  %v4743_v47 = vld [vmem:[%s6193_s1 + $0x1b0] sm:$0xff]  ;;  %v4742_v52 = vld [vmem:[%s6193_s1 + $0x1a8] sm:$0xff] }
  0x1e   :  { %2784 = vmatpush.bf16.msra.mxu0 %v4689_v29  ;;  %v4751_v48 = vld [vmem:[%s6193_s1 + $0x1f0] sm:$0xff]  ;;  %v4750_v53 = vld [vmem:[%s6193_s1 + $0x1e8] sm:$0xff]  ;;  %v4725_v56 = vld [vmem:[%s6193_s1 + $0x120] sm:$0xff] }
  0x1f   :  { %2810 = vmatpush.bf16.msra.mxu2 %v4705_v30  ;;  %v4735_v50 = vld [vmem:[%s6193_s1 + $0x170] sm:$0xff]  ;;  %v4734_v54 = vld [vmem:[%s6193_s1 + $0x168] sm:$0xff]  ;;  %v31_v58 = vld [vmem:[%s6192_s0 + $0x18] sm:$0xff] }
  0x20   :  { %2823 = vmatpush.bf16.msra.mxu3 %v4713_v36  ;;  %v4741_v61 = vld [vmem:[%s6193_s1 + $0x1a0] sm:$0xff]  ;;  %v4724_v0 = vld [vmem:[%s6193_s1 + $0x118] sm:$0xff]  ;;  %v4723_v4 = vld [vmem:[%s6193_s1 + $0x110] sm:$0xff] }
  0x21   :  { %2797 = vmatpush.bf16.msra.mxu1 %v4697_v40  ;;  %2785 = vmatmul.bf16.vlgmr.msra.gmra.mxu0 %v144_v44  ;;  %v4749_v62 = vld [vmem:[%s6193_s1 + $0x1e0] sm:$0xff]  ;;  %v4740_v1 = vld [vmem:[%s6193_s1 + $0x198] sm:$0xff]  ;;  %v4739_v5 = vld [vmem:[%s6193_s1 + $0x190] sm:$0xff] }
  0x22   :  { %2829 = vmatpush.bf16.msrb.mxu0 %v4728_v37  ;;  %2811 = vmatmul.bf16.vlgmr.msra.gmra.mxu2 %v146_v41  ;;  %v4733_v63 = vld [vmem:[%s6193_s1 + $0x160] sm:$0xff]  ;;  %v4748_v2 = vld [vmem:[%s6193_s1 + $0x1d8] sm:$0xff]  ;;  %v4747_v6 = vld [vmem:[%s6193_s1 + $0x1d0] sm:$0xff] }
  0x23   :  { %2855 = vmatpush.bf16.msrb.mxu2 %v4744_v38  ;;  %2824 = vmatmul.bf16.vlgmr.msra.gmra.mxu3 %v147_v46  ;;  %v5223_v55 = vld.sshfl [vmem:[#allocation1 + $0x30] sm:$0xff pattern:$0x73625140]  ;;  %v5228_v57 = vld.sshfl [vmem:[#allocation1 + $0x20] sm:$0xff pattern:$0x73625140] }
  0x24   :  { %2868 = vmatpush.bf16.msrb.mxu3 %v4752_v39  ;;  %2798 = vmatmul.bf16.vlgmr.msra.gmra.mxu1 %v145_v49  ;;  %v5233_v59 = vld.sshfl [vmem:[#allocation1 + $0x38] sm:$0xff pattern:$0x73625140]  ;;  %v5235_v60 = vld.sshfl [vmem:[#allocation1 + $0x28] sm:$0xff pattern:$0x73625140]  ;;  %v150_v20 = vpack.c.bf16 %v5223_v55, %v5223_v55  ;;  %v148_v22 = vpack.c.bf16 %v5228_v57, %v5228_v57 }
  0x25   :  { %2842 = vmatpush.bf16.msrb.mxu1 %v4736_v43  ;;  %62 = vst [vmem:[#allocation1 + $0x20] ss:$4 sm:$0xff] %v31_v58  ;;  %v4732_v3 = vld [vmem:[%s6193_s1 + $0x158] sm:$0xff]  ;;  %v4731_v7 = vld [vmem:[%s6193_s1 + $0x150] sm:$0xff]  ;;  %v4722_v8 = vld [vmem:[%s6193_s1 + $0x108] sm:$0xff]  ;;  %v151_v23 = vpack.c.bf16 %v5233_v59, %v5233_v59  ;;  %v149_v27 = vpack.c.bf16 %v5235_v60, %v5235_v60 }
  0x26   :  { %2830 = vmatpush.bf16.msrb.mxu0 %v4727_v45  ;;  %v4738_v9 = vld [vmem:[%s6193_s1 + $0x188] sm:$0xff]  ;;  %v4721_v12 = vld [vmem:[%s6193_s1 + $0x100] sm:$0xff]  ;;  %v4760_v15 = vld [vmem:[%s6193_s1 + $0x238] sm:$0xff] }
  0x27   :  { %2856 = vmatpush.bf16.msrb.mxu2 %v4743_v47  ;;  %v4746_v10 = vld [vmem:[%s6193_s1 + $0x1c8] sm:$0xff]  ;;  %v4737_v13 = vld [vmem:[%s6193_s1 + $0x180] sm:$0xff]  ;;  %v4776_v16 = vld [vmem:[%s6193_s1 + $0x2b8] sm:$0xff] }
  0x28   :  { %2869 = vmatpush.bf16.msrb.mxu3 %v4751_v48  ;;  %v4730_v11 = vld [vmem:[%s6193_s1 + $0x148] sm:$0xff]  ;;  %v4745_v14 = vld [vmem:[%s6193_s1 + $0x1c0] sm:$0xff]  ;;  %v4784_v17 = vld [vmem:[%s6193_s1 + $0x2f8] sm:$0xff] }
  0x29   :  { %2843 = vmatpush.bf16.msrb.mxu1 %v4735_v50  ;;  %v4729_v18 = vld [vmem:[%s6193_s1 + $0x140] sm:$0xff]  ;;  %v4768_v19 = vld [vmem:[%s6193_s1 + $0x278] sm:$0xff]  ;;  %v4759_v21 = vld [vmem:[%s6193_s1 + $0x230] sm:$0xff] }
  0x2a   :  { %2831 = vmatpush.bf16.msrb.mxu0 %v4726_v51  ;;  %v4775_v24 = vld [vmem:[%s6193_s1 + $0x2b0] sm:$0xff]  ;;  %v5321_v26 = vld.sshfl [vmem:[#allocation1] sm:$0xff pattern:$0x73625140]  ;;  %v4758_v33 = vld [vmem:[%s6193_s1 + $0x228] sm:$0xff] }
  0x2b   :  { %2857 = vmatpush.bf16.msrb.mxu2 %v4742_v52  ;;  %v4783_v25 = vld [vmem:[%s6193_s1 + $0x2f0] sm:$0xff]  ;;  %v5327_v29 = vld.sshfl [vmem:[#allocation1 + $0x8] sm:$0xff pattern:$0x73625140]  ;;  %v32_v31 = vld [vmem:[%s6192_s0 + $0x20] sm:$0xff]  ;;  %v152_v60 = vpack.c.bf16 %v5321_v26, %v5321_v26 }
  0x2c   :  { %2870 = vmatpush.bf16.msrb.mxu3 %v4750_v53  ;;  %v5325_v28 = vld.sshfl [vmem:[#allocation1 + $0x10] sm:$0xff pattern:$0x73625140]  ;;  %v5335_v32 = vld.sshfl [vmem:[#allocation1 + $0x18] sm:$0xff pattern:$0x73625140] }
  0x2d   :  { %2844 = vmatpush.bf16.msrb.mxu1 %v4734_v54  ;;  %v4767_v30 = vld [vmem:[%s6193_s1 + $0x270] sm:$0xff]  ;;  %71 = vst [vmem:[#allocation1] ss:$4 sm:$0xff] %v32_v31  ;;  %v4774_v34 = vld [vmem:[%s6193_s1 + $0x2a8] sm:$0xff]  ;;  %v4757_v37 = vld [vmem:[%s6193_s1 + $0x220] sm:$0xff] }
  0x2e   :  { %2832 = vmatpush.bf16.msrb.mxu0 %v4725_v56  ;;  %v4782_v35 = vld [vmem:[%s6193_s1 + $0x2e8] sm:$0xff]  ;;  %v4773_v38 = vld [vmem:[%s6193_s1 + $0x2a0] sm:$0xff]  ;;  %v4756_v41 = vld [vmem:[%s6193_s1 + $0x218] sm:$0xff] }
  0x2f   :  { %2858 = vmatpush.bf16.msrb.mxu2 %v4741_v61  ;;  %v4766_v36 = vld [vmem:[%s6193_s1 + $0x268] sm:$0xff]  ;;  %v4781_v39 = vld [vmem:[%s6193_s1 + $0x2e0] sm:$0xff]  ;;  %v4772_v42 = vld [vmem:[%s6193_s1 + $0x298] sm:$0xff]  ;;  %v154_v61 = vpack.c.bf16 %v5325_v28, %v5325_v28 }
  0x30   :  { %2871 = vmatpush.bf16.msrb.mxu3 %v4749_v62  ;;  %v4765_v40 = vld [vmem:[%s6193_s1 + $0x260] sm:$0xff]  ;;  %v4780_v43 = vld [vmem:[%s6193_s1 + $0x2d8] sm:$0xff]  ;;  %v4755_v45 = vld [vmem:[%s6193_s1 + $0x210] sm:$0xff] }
  0x31   :  { %2845 = vmatpush.bf16.msrb.mxu1 %v4733_v63  ;;  %v4764_v44 = vld [vmem:[%s6193_s1 + $0x258] sm:$0xff]  ;;  %v4771_v46 = vld [vmem:[%s6193_s1 + $0x290] sm:$0xff]  ;;  %v4754_v49 = vld [vmem:[%s6193_s1 + $0x208] sm:$0xff]  ;;  %v155_v63 = vpack.c.bf16 %v5335_v32, %v5335_v32 }
  0x32   :  { %2833 = vmatpush.bf16.msrb.mxu0 %v4724_v0  ;;  %v4779_v47 = vld [vmem:[%s6193_s1 + $0x2d0] sm:$0xff]  ;;  %v4770_v50 = vld [vmem:[%s6193_s1 + $0x288] sm:$0xff]  ;;  %v4753_v53 = vld [vmem:[%s6193_s1 + $0x200] sm:$0xff] }
  0x33   :  { %2859 = vmatpush.bf16.msrb.mxu2 %v4740_v1  ;;  %v4763_v48 = vld [vmem:[%s6193_s1 + $0x250] sm:$0xff]  ;;  %v4778_v51 = vld [vmem:[%s6193_s1 + $0x2c8] sm:$0xff]  ;;  %v4769_v54 = vld [vmem:[%s6193_s1 + $0x280] sm:$0xff] }
  0x34   :  { %2872 = vmatpush.bf16.msrb.mxu3 %v4748_v2  ;;  %v4762_v52 = vld [vmem:[%s6193_s1 + $0x248] sm:$0xff]  ;;  %v4777_v55 = vld [vmem:[%s6193_s1 + $0x2c0] sm:$0xff]  ;;  %v4792_v56 = vld [vmem:[%s6193_s1 + $0x338] sm:$0xff] }
  0x35   :  { %2846 = vmatpush.bf16.msrb.mxu1 %v4732_v3  ;;  %v4808_v57 = vld [vmem:[%s6193_s1 + $0x3b8] sm:$0xff]  ;;  %v4761_v59 = vld [vmem:[%s6193_s1 + $0x240] sm:$0xff]  ;;  %v4791_v0 = vld [vmem:[%s6193_s1 + $0x330] sm:$0xff]  ;;  %v153_v3 = vpack.c.bf16 %v5327_v29, %v5327_v29 }
  0x36   :  { %2834 = vmatpush.bf16.msrb.mxu0 %v4723_v4  ;;  %v4816_v58 = vld [vmem:[%s6193_s1 + $0x3f8] sm:$0xff]  ;;  %v4807_v1 = vld [vmem:[%s6193_s1 + $0x3b0] sm:$0xff]  ;;  %v5433_v2 = vld.sshfl [vmem:[#allocation1 + $0x20] sm:$0xff pattern:$0x73625140] }
  0x37   :  { %2860 = vmatpush.bf16.msrb.mxu2 %v4739_v5  ;;  %v4800_v62 = vld [vmem:[%s6193_s1 + $0x378] sm:$0xff]  ;;  %v5437_v4 = vld.sshfl [vmem:[#allocation1 + $0x30] sm:$0xff pattern:$0x73625140]  ;;  %v4786_v26 = vld [vmem:[%s6193_s1 + $0x308] sm:$0xff] }
  0x38   :  { %2873 = vmatpush.bf16.msrb.mxu3 %v4747_v6  ;;  %v5439_v5 = vld.sshfl [vmem:[#allocation1 + $0x28] sm:$0xff pattern:$0x73625140]  ;;  %v4815_v6 = vld [vmem:[%s6193_s1 + $0x3f0] sm:$0xff]  ;;  %v4801_v31 = vld [vmem:[%s6193_s1 + $0x380] sm:$0xff] }
  0x39   :  { %2847 = vmatpush.bf16.msrb.mxu1 %v4731_v7  ;;  %v33_v7 = vld [vmem:[%s6192_s0 + $0x28] sm:$0xff]  ;;  %v4824_v32 = vld [vmem:[%s6193_s1 + $0x438] sm:$0xff] }
  0x3a   :  { %2835 = vmatpush.bf16.msrb.mxu0 %v4722_v8  ;;  %v5447_v8 = vld.sshfl [vmem:[#allocation1 + $0x38] sm:$0xff pattern:$0x73625140]  ;;  %v4810_v28 = vld [vmem:[%s6193_s1 + $0x3c8] sm:$0xff] }
  0x3b   :  { %2861 = vmatpush.bf16.msrb.mxu2 %v4738_v9  ;;  %v4799_v9 = vld [vmem:[%s6193_s1 + $0x370] sm:$0xff]  ;;  %72 = vst [vmem:[#allocation1 + $0x20] ss:$4 sm:$0xff] %v33_v7  ;;  %v4794_v29 = vld [vmem:[%s6193_s1 + $0x348] sm:$0xff]  ;;  %v4856_v7 = vld [vmem:[%s6193_s1 + $0x538] sm:$0xff] }
  0x3c   :  { %2874 = vmatpush.bf16.msrb.mxu3 %v4746_v10  ;;  %v4790_v10 = vld [vmem:[%s6193_s1 + $0x328] sm:$0xff] }
  0x3d   :  { %2848 = vmatpush.bf16.msrb.mxu1 %v4730_v11  ;;  %v4806_v11 = vld [vmem:[%s6193_s1 + $0x3a8] sm:$0xff] }
  0x3e   :  { %2836 = vmatpush.bf16.msrb.mxu0 %v4721_v12  ;;  %v4814_v12 = vld [vmem:[%s6193_s1 + $0x3e8] sm:$0xff] }
  0x3f   :  { %2862 = vmatpush.bf16.msrb.mxu2 %v4737_v13  ;;  %v4798_v13 = vld [vmem:[%s6193_s1 + $0x368] sm:$0xff] }
  0x40   :  { %2875 = vmatpush.bf16.msrb.mxu3 %v4745_v14  ;;  %v4789_v14 = vld [vmem:[%s6193_s1 + $0x320] sm:$0xff] }
  0x41   :  { %2849 = vmatpush.bf16.msrb.mxu1 %v4729_v18  ;;  %2837 = vmatmul.bf16.vlgmr.msrb.gmra.mxu0 %v148_v22  ;;  %v4788_v18 = vld [vmem:[%s6193_s1 + $0x318] sm:$0xff]  ;;  %v4787_v22 = vld [vmem:[%s6193_s1 + $0x310] sm:$0xff] }
  0x42   :  { %2881 = vmatpush.bf16.msra.mxu0 %v4760_v15  ;;  %2863 = vmatmul.bf16.vlgmr.msrb.gmra.mxu2 %v150_v20  ;;  %v4805_v15 = vld [vmem:[%s6193_s1 + $0x3a0] sm:$0xff]  ;;  %v4812_v20 = vld [vmem:[%s6193_s1 + $0x3d8] sm:$0xff] }
  0x43   :  { %2907 = vmatpush.bf16.msra.mxu2 %v4776_v16  ;;  %2876 = vmatmul.bf16.vlgmr.msrb.gmra.mxu3 %v151_v23  ;;  %v4813_v16 = vld [vmem:[%s6193_s1 + $0x3e0] sm:$0xff]  ;;  %v4803_v23 = vld [vmem:[%s6193_s1 + $0x390] sm:$0xff] }
  0x44   :  { %2920 = vmatpush.bf16.msra.mxu3 %v4784_v17  ;;  %2850 = vmatmul.bf16.vlgmr.msrb.gmra.mxu1 %v149_v27  ;;  %v4797_v17 = vld [vmem:[%s6193_s1 + $0x360] sm:$0xff]  ;;  %v4802_v27 = vld [vmem:[%s6193_s1 + $0x388] sm:$0xff] }
  0x45   :  { %2894 = vmatpush.bf16.msra.mxu1 %v4768_v19  ;;  %v4804_v19 = vld [vmem:[%s6193_s1 + $0x398] sm:$0xff] }
  0x46   :  { %2882 = vmatpush.bf16.msra.mxu0 %v4759_v21  ;;  %v4796_v21 = vld [vmem:[%s6193_s1 + $0x358] sm:$0xff] }
  0x47   :  { %2908 = vmatpush.bf16.msra.mxu2 %v4775_v24  ;;  %v4811_v24 = vld [vmem:[%s6193_s1 + $0x3d0] sm:$0xff] }
  0x48   :  { %2921 = vmatpush.bf16.msra.mxu3 %v4783_v25  ;;  %v4795_v25 = vld [vmem:[%s6193_s1 + $0x350] sm:$0xff] }
  0x49   :  { %2895 = vmatpush.bf16.msra.mxu1 %v4767_v30  ;;  %v4785_v30 = vld [vmem:[%s6193_s1 + $0x300] sm:$0xff] }
  0x4a   :  { %2883 = vmatpush.bf16.msra.mxu0 %v4758_v33  ;;  %v4809_v33 = vld [vmem:[%s6193_s1 + $0x3c0] sm:$0xff] }
  0x4b   :  { %2909 = vmatpush.bf16.msra.mxu2 %v4774_v34  ;;  %v4840_v34 = vld [vmem:[%s6193_s1 + $0x4b8] sm:$0xff] }
  0x4c   :  { %2922 = vmatpush.bf16.msra.mxu3 %v4782_v35  ;;  %v4848_v35 = vld [vmem:[%s6193_s1 + $0x4f8] sm:$0xff] }
  0x4d   :  { %2896 = vmatpush.bf16.msra.mxu1 %v4766_v36  ;;  %v4793_v36 = vld [vmem:[%s6193_s1 + $0x340] sm:$0xff] }
  0x4e   :  { %2884 = vmatpush.bf16.msra.mxu0 %v4757_v37  ;;  %v156_v37 = vpack.c.bf16 %v5433_v2, %v5433_v2  ;;  %v4817_v2 = vld [vmem:[%s6193_s1 + $0x400] sm:$0xff] }
  0x4f   :  { %2910 = vmatpush.bf16.msra.mxu2 %v4773_v38  ;;  %v158_v38 = vpack.c.bf16 %v5437_v4, %v5437_v4  ;;  %v4841_v4 = vld [vmem:[%s6193_s1 + $0x4c0] sm:$0xff] }
  0x50   :  { %2923 = vmatpush.bf16.msra.mxu3 %v4781_v39  ;;  %v4832_v39 = vld [vmem:[%s6193_s1 + $0x478] sm:$0xff] }
  0x51   :  { %2897 = vmatpush.bf16.msra.mxu1 %v4765_v40  ;;  %v159_v40 = vpack.c.bf16 %v5447_v8, %v5447_v8  ;;  %v4872_v8 = vld [vmem:[%s6193_s1 + $0x5b8] sm:$0xff] }
  0x52   :  { %2885 = vmatpush.bf16.msra.mxu0 %v4756_v41  ;;  %v157_v41 = vpack.c.bf16 %v5439_v5, %v5439_v5  ;;  %v73_v5 = vld.sshfl [vmem:[#allocation1] sm:$0xff pattern:$0x73625140] }
  0x53   :  { %2911 = vmatpush.bf16.msra.mxu2 %v4772_v42  ;;  %v4823_v42 = vld [vmem:[%s6193_s1 + $0x430] sm:$0xff] }
  0x54   :  { %2924 = vmatpush.bf16.msra.mxu3 %v4780_v43  ;;  %v4839_v43 = vld [vmem:[%s6193_s1 + $0x4b0] sm:$0xff] }
  0x55   :  { %2898 = vmatpush.bf16.msra.mxu1 %v4764_v44  ;;  %v4847_v44 = vld [vmem:[%s6193_s1 + $0x4f0] sm:$0xff] }
  0x56   :  { %2886 = vmatpush.bf16.msra.mxu0 %v4755_v45  ;;  %v4831_v45 = vld [vmem:[%s6193_s1 + $0x470] sm:$0xff] }
  0x57   :  { %2912 = vmatpush.bf16.msra.mxu2 %v4771_v46  ;;  %v4822_v46 = vld [vmem:[%s6193_s1 + $0x428] sm:$0xff] }
  0x58   :  { %2925 = vmatpush.bf16.msra.mxu3 %v4779_v47  ;;  %v4838_v47 = vld [vmem:[%s6193_s1 + $0x4a8] sm:$0xff] }
  0x59   :  { %2899 = vmatpush.bf16.msra.mxu1 %v4763_v48  ;;  %v4846_v48 = vld [vmem:[%s6193_s1 + $0x4e8] sm:$0xff] }
  0x5a   :  { %2887 = vmatpush.bf16.msra.mxu0 %v4754_v49  ;;  %v4830_v49 = vld [vmem:[%s6193_s1 + $0x468] sm:$0xff] }
  0x5b   :  { %2913 = vmatpush.bf16.msra.mxu2 %v4770_v50  ;;  %v4821_v50 = vld [vmem:[%s6193_s1 + $0x420] sm:$0xff] }
  0x5c   :  { %2926 = vmatpush.bf16.msra.mxu3 %v4778_v51  ;;  %v4837_v51 = vld [vmem:[%s6193_s1 + $0x4a0] sm:$0xff] }
  0x5d   :  { %2900 = vmatpush.bf16.msra.mxu1 %v4762_v52  ;;  %v4845_v52 = vld [vmem:[%s6193_s1 + $0x4e0] sm:$0xff] }
  0x5e   :  { %2888 = vmatpush.bf16.msra.mxu0 %v4753_v53  ;;  %v4829_v53 = vld [vmem:[%s6193_s1 + $0x460] sm:$0xff] }
  0x5f   :  { %2914 = vmatpush.bf16.msra.mxu2 %v4769_v54  ;;  %v4820_v54 = vld [vmem:[%s6193_s1 + $0x418] sm:$0xff] }
  0x60   :  { %2927 = vmatpush.bf16.msra.mxu3 %v4777_v55  ;;  %v4836_v55 = vld [vmem:[%s6193_s1 + $0x498] sm:$0xff] }
  0x61   :  { %2901 = vmatpush.bf16.msra.mxu1 %v4761_v59  ;;  %2889 = vmatmul.bf16.vlgmr.msra.gmra.mxu0 %v152_v60  ;;  %v4835_v59 = vld [vmem:[%s6193_s1 + $0x490] sm:$0xff] }
  0x62   :  { %2933 = vmatpush.bf16.msrb.mxu0 %v4792_v56  ;;  %2915 = vmatmul.bf16.vlgmr.msra.gmra.mxu2 %v154_v61  ;;  %v4844_v56 = vld [vmem:[%s6193_s1 + $0x4d8] sm:$0xff]  ;;  %v4843_v60 = vld [vmem:[%s6193_s1 + $0x4d0] sm:$0xff] }
  0x63   :  { %2959 = vmatpush.bf16.msrb.mxu2 %v4808_v57  ;;  %2928 = vmatmul.bf16.vlgmr.msra.gmra.mxu3 %v155_v63  ;;  %v4828_v57 = vld [vmem:[%s6193_s1 + $0x458] sm:$0xff]  ;;  %v4827_v61 = vld [vmem:[%s6193_s1 + $0x450] sm:$0xff]  ;;  %v4834_v63 = vld [vmem:[%s6193_s1 + $0x488] sm:$0xff] }
  0x64   :  { %2972 = vmatpush.bf16.msrb.mxu3 %v4816_v58  ;;  %2902 = vmatmul.bf16.vlgmr.msra.gmra.mxu1 %v153_v3  ;;  %v4819_v58 = vld [vmem:[%s6193_s1 + $0x410] sm:$0xff]  ;;  %v4833_v3 = vld [vmem:[%s6193_s1 + $0x480] sm:$0xff] }
  0x65   :  { %2946 = vmatpush.bf16.msrb.mxu1 %v4800_v62  ;;  %v4818_v62 = vld [vmem:[%s6193_s1 + $0x408] sm:$0xff] }
  0x66   :  { %2934 = vmatpush.bf16.msrb.mxu0 %v4791_v0  ;;  %v4842_v0 = vld [vmem:[%s6193_s1 + $0x4c8] sm:$0xff] }
  0x67   :  { %2960 = vmatpush.bf16.msrb.mxu2 %v4807_v1  ;;  %v4826_v1 = vld [vmem:[%s6193_s1 + $0x448] sm:$0xff] }
  0x68   :  { %2973 = vmatpush.bf16.msrb.mxu3 %v4815_v6  ;;  %v75_v6 = vld.sshfl [vmem:[#allocation1 + $0x10] sm:$0xff pattern:$0x73625140] }
  0x69   :  { %2947 = vmatpush.bf16.msrb.mxu1 %v4799_v9  ;;  %v76_v9 = vld.sshfl [vmem:[#allocation1 + $0x18] sm:$0xff pattern:$0x73625140] }
  0x6a   :  { %2935 = vmatpush.bf16.msrb.mxu0 %v4790_v10  ;;  %v4880_v10 = vld [vmem:[%s6193_s1 + $0x5f8] sm:$0xff] }
  0x6b   :  { %2961 = vmatpush.bf16.msrb.mxu2 %v4806_v11  ;;  %v4825_v11 = vld [vmem:[%s6193_s1 + $0x440] sm:$0xff] }
  0x6c   :  { %2974 = vmatpush.bf16.msrb.mxu3 %v4814_v12  ;;  %v74_v12 = vld.sshfl [vmem:[#allocation1 + $0x8] sm:$0xff pattern:$0x73625140] }
  0x6d   :  { %2948 = vmatpush.bf16.msrb.mxu1 %v4798_v13  ;;  %v160_v13 = vpack.c.bf16 %v73_v5, %v73_v5  ;;  %v4896_v5 = vld [vmem:[%s6193_s1 + $0x678] sm:$0xff] }
  0x6e   :  { %2936 = vmatpush.bf16.msrb.mxu0 %v4789_v14  ;;  %v162_v14 = vpack.c.bf16 %v75_v6, %v75_v6 }
  0x6f   :  { %2962 = vmatpush.bf16.msrb.mxu2 %v4805_v15  ;;  %v4864_v15 = vld [vmem:[%s6193_s1 + $0x578] sm:$0xff] }
  0x70   :  { %2975 = vmatpush.bf16.msrb.mxu3 %v4813_v16  ;;  %v163_v16 = vpack.c.bf16 %v76_v9, %v76_v9  ;;  %v4903_v9 = vld [vmem:[%s6193_s1 + $0x6b0] sm:$0xff] }
  0x71   :  { %2949 = vmatpush.bf16.msrb.mxu1 %v4797_v17  ;;  %v161_v17 = vpack.c.bf16 %v74_v12, %v74_v12  ;;  %v4886_v12 = vld [vmem:[%s6193_s1 + $0x628] sm:$0xff] }
  0x72   :  { %2937 = vmatpush.bf16.msrb.mxu0 %v4788_v18  ;;  %v4855_v18 = vld [vmem:[%s6193_s1 + $0x530] sm:$0xff] }
  0x73   :  { %2963 = vmatpush.bf16.msrb.mxu2 %v4804_v19  ;;  %v4871_v19 = vld [vmem:[%s6193_s1 + $0x5b0] sm:$0xff] }
  0x74   :  { %2976 = vmatpush.bf16.msrb.mxu3 %v4812_v20  ;;  %v4879_v20 = vld [vmem:[%s6193_s1 + $0x5f0] sm:$0xff] }
  0x75   :  { %2950 = vmatpush.bf16.msrb.mxu1 %v4796_v21  ;;  %v4863_v21 = vld [vmem:[%s6193_s1 + $0x570] sm:$0xff] }
  0x76   :  { %2938 = vmatpush.bf16.msrb.mxu0 %v4787_v22  ;;  %v4854_v22 = vld [vmem:[%s6193_s1 + $0x528] sm:$0xff] }
  0x77   :  { %2964 = vmatpush.bf16.msrb.mxu2 %v4803_v23  ;;  %v4870_v23 = vld [vmem:[%s6193_s1 + $0x5a8] sm:$0xff] }
  0x78   :  { %2977 = vmatpush.bf16.msrb.mxu3 %v4811_v24  ;;  %v4878_v24 = vld [vmem:[%s6193_s1 + $0x5e8] sm:$0xff] }
  0x79   :  { %2951 = vmatpush.bf16.msrb.mxu1 %v4795_v25  ;;  %v5012_v25 = vld [vmem:[%s6194_s2] ss:$0 sm:$0xff] }
  0x7a   :  { %2939 = vmatpush.bf16.msrb.mxu0 %v4786_v26  ;;  %v4862_v26 = vld [vmem:[%s6193_s1 + $0x568] sm:$0xff] }
  0x7b   :  { %2965 = vmatpush.bf16.msrb.mxu2 %v4802_v27  ;;  %v4853_v27 = vld [vmem:[%s6193_s1 + $0x520] sm:$0xff] }
  0x7c   :  { %2978 = vmatpush.bf16.msrb.mxu3 %v4810_v28  ;;  %v4869_v28 = vld [vmem:[%s6193_s1 + $0x5a0] sm:$0xff] }
  0x7d   :  { %2952 = vmatpush.bf16.msrb.mxu1 %v4794_v29  ;;  %v4877_v29 = vld [vmem:[%s6193_s1 + $0x5e0] sm:$0xff] }
  0x7e   :  { %2940 = vmatpush.bf16.msrb.mxu0 %v4785_v30 }
  0x7f   :  { %2966 = vmatpush.bf16.msrb.mxu2 %v4801_v31 }
  0x80   :  { %2979 = vmatpush.bf16.msrb.mxu3 %v4809_v33  ;;  %v4852_v33 = vld [vmem:[%s6193_s1 + $0x518] sm:$0xff] }
  0x81   :  { %2953 = vmatpush.bf16.msrb.mxu1 %v4793_v36  ;;  %2941 = vmatmul.bf16.vlgmr.msrb.gmra.mxu0 %v156_v37  ;;  %v4876_v36 = vld [vmem:[%s6193_s1 + $0x5d8] sm:$0xff] }
  0x82   :  { %2985 = vmatpush.bf16.msra.mxu0 %v4824_v32  ;;  %2967 = vmatmul.bf16.vlgmr.msrb.gmra.mxu2 %v158_v38  ;;  %v4861_v32 = vld [vmem:[%s6193_s1 + $0x560] sm:$0xff] }
  0x83   :  { %3011 = vmatpush.bf16.msra.mxu2 %v4840_v34  ;;  %2980 = vmatmul.bf16.vlgmr.msrb.gmra.mxu3 %v159_v40 }
  0x84   :  { %3024 = vmatpush.bf16.msra.mxu3 %v4848_v35  ;;  %2954 = vmatmul.bf16.vlgmr.msrb.gmra.mxu1 %v157_v41  ;;  %v4868_v35 = vld [vmem:[%s6193_s1 + $0x598] sm:$0xff]  ;;  %v4851_v41 = vld [vmem:[%s6193_s1 + $0x510] sm:$0xff] }
  0x85   :  { %2998 = vmatpush.bf16.msra.mxu1 %v4832_v39  ;;  %v4860_v39 = vld [vmem:[%s6193_s1 + $0x558] sm:$0xff] }
  0x86   :  { %2986 = vmatpush.bf16.msra.mxu0 %v4823_v42 }
  0x87   :  { %3012 = vmatpush.bf16.msra.mxu2 %v4839_v43  ;;  %v4867_v43 = vld [vmem:[%s6193_s1 + $0x590] sm:$0xff] }
  0x88   :  { %3025 = vmatpush.bf16.msra.mxu3 %v4847_v44  ;;  %v4875_v44 = vld [vmem:[%s6193_s1 + $0x5d0] sm:$0xff] }
  0x89   :  { %2999 = vmatpush.bf16.msra.mxu1 %v4831_v45 }
  0x8a   :  { %2987 = vmatpush.bf16.msra.mxu0 %v4822_v46 }
  0x8b   :  { %3013 = vmatpush.bf16.msra.mxu2 %v4838_v47  ;;  %v4859_v47 = vld [vmem:[%s6193_s1 + $0x550] sm:$0xff] }
  0x8c   :  { %3026 = vmatpush.bf16.msra.mxu3 %v4846_v48  ;;  %v4850_v48 = vld [vmem:[%s6193_s1 + $0x508] sm:$0xff] }
  0x8d   :  { %3000 = vmatpush.bf16.msra.mxu1 %v4830_v49 }
  0x8e   :  { %2988 = vmatpush.bf16.msra.mxu0 %v4821_v50  ;;  %v34_v50 = vld [vmem:[%s6192_s0 + $0x30] sm:$0xff] }
  0x8f   :  { %3014 = vmatpush.bf16.msra.mxu2 %v4837_v51  ;;  %v4866_v51 = vld [vmem:[%s6193_s1 + $0x588] sm:$0xff]  ;;  %81 = vst [vmem:[#allocation1] ss:$4 sm:$0xff] %v34_v50  ;;  %v4920_v50 = vld [vmem:[%s6193_s1 + $0x738] sm:$0xff] }
  0x90   :  { %3027 = vmatpush.bf16.msra.mxu3 %v4845_v52  ;;  %v4874_v52 = vld [vmem:[%s6193_s1 + $0x5c8] sm:$0xff] }
  0x91   :  { %3001 = vmatpush.bf16.msra.mxu1 %v4829_v53 }
  0x92   :  { %2989 = vmatpush.bf16.msra.mxu0 %v4820_v54  ;;  %v4858_v54 = vld [vmem:[%s6193_s1 + $0x548] sm:$0xff] }
  0x93   :  { %3015 = vmatpush.bf16.msra.mxu2 %v4836_v55  ;;  %v4849_v55 = vld [vmem:[%s6193_s1 + $0x500] sm:$0xff] }
  0x94   :  { %3028 = vmatpush.bf16.msra.mxu3 %v4844_v56  ;;  %v4865_v56 = vld [vmem:[%s6193_s1 + $0x580] sm:$0xff] }
  0x95   :  { %3002 = vmatpush.bf16.msra.mxu1 %v4828_v57  ;;  %v4873_v57 = vld [vmem:[%s6193_s1 + $0x5c0] sm:$0xff] }
  0x96   :  { %2990 = vmatpush.bf16.msra.mxu0 %v4819_v58 }
  0x97   :  { %3016 = vmatpush.bf16.msra.mxu2 %v4835_v59  ;;  %v77_v59 = vld.sshfl [vmem:[#allocation1 + $0x20] sm:$0xff pattern:$0x73625140] }
  0x98   :  { %3029 = vmatpush.bf16.msra.mxu3 %v4843_v60  ;;  %v79_v60 = vld.sshfl [vmem:[#allocation1 + $0x30] sm:$0xff pattern:$0x73625140] }
  0x99   :  { %3003 = vmatpush.bf16.msra.mxu1 %v4827_v61  ;;  %v4888_v61 = vld [vmem:[%s6193_s1 + $0x638] sm:$0xff] }
  0x9a   :  { %2991 = vmatpush.bf16.msra.mxu0 %v4818_v62  ;;  %v4904_v62 = vld [vmem:[%s6193_s1 + $0x6b8] sm:$0xff] }
  0x9b   :  { %3017 = vmatpush.bf16.msra.mxu2 %v4834_v63  ;;  %v80_v63 = vld.sshfl [vmem:[#allocation1 + $0x38] sm:$0xff pattern:$0x73625140] }
  0x9c   :  { %3030 = vmatpush.bf16.msra.mxu3 %v4842_v0  ;;  %v4912_v0 = vld [vmem:[%s6193_s1 + $0x6f8] sm:$0xff]  ;;  %v167_v6 = vpack.c.bf16 %v80_v63, %v80_v63  ;;  %v4943_v63 = vld [vmem:[%s6193_s1 + $0x7f0] sm:$0xff] }
  0x9d   :  { %3004 = vmatpush.bf16.msra.mxu1 %v4826_v1  ;;  %v4857_v1 = vld [vmem:[%s6193_s1 + $0x540] sm:$0xff] }
  0x9e   :  { %2992 = vmatpush.bf16.msra.mxu0 %v4817_v2  ;;  %v2786_v30 = vpop.f32.mrf.mxu0  ;;  %v78_v2 = vld.sshfl [vmem:[#allocation1 + $0x28] sm:$0xff pattern:$0x73625140] }
  0x9f   :  { %3018 = vmatpush.bf16.msra.mxu2 %v4833_v3  ;;  %v2787_v31 = vadd.f32 %v5012_v25, %v2786_v30  ;;  %v164_v3 = vpack.c.bf16 %v77_v59, %v77_v59  ;;  %v4900_v25 = vld [vmem:[%s6193_s1 + $0x698] sm:$0xff] }
  0xa0   :  { %3031 = vmatpush.bf16.msra.mxu3 %v4841_v4  ;;  %v166_v4 = vpack.c.bf16 %v79_v60, %v79_v60 }
  0xa1   :  { %3005 = vmatpush.bf16.msra.mxu1 %v4825_v11  ;;  %2993 = vmatmul.bf16.vlgmr.msra.gmra.mxu0 %v160_v13  ;;  %v2799_v34 = vpop.f32.mrf.mxu1  ;;  %v4895_v11 = vld [vmem:[%s6193_s1 + $0x670] sm:$0xff]  ;;  %v4902_v13 = vld [vmem:[%s6193_s1 + $0x6a8] sm:$0xff] }
  0xa2   :  { %3037 = vmatpush.bf16.msrb.mxu0 %v4856_v7  ;;  %3019 = vmatmul.bf16.vlgmr.msra.gmra.mxu2 %v162_v14  ;;  %v2800_v37 = vadd.f32 %v2799_v34, %v2787_v31  ;;  %v165_v7 = vpack.c.bf16 %v78_v2, %v78_v2  ;;  %v4910_v14 = vld [vmem:[%s6193_s1 + $0x6e8] sm:$0xff]  ;;  %v4883_v31 = vld [vmem:[%s6193_s1 + $0x610] sm:$0xff] }
  0xa3   :  { %3063 = vmatpush.bf16.msrb.mxu2 %v4872_v8  ;;  %3032 = vmatmul.bf16.vlgmr.msra.gmra.mxu3 %v163_v16  ;;  %v4887_v8 = vld [vmem:[%s6193_s1 + $0x630] sm:$0xff]  ;;  %v4885_v16 = vld [vmem:[%s6193_s1 + $0x620] sm:$0xff]  ;;  %v4934_v2 = vld [vmem:[%s6193_s1 + $0x7a8] sm:$0xff] }
  0xa4   :  { %3076 = vmatpush.bf16.msrb.mxu3 %v4880_v10  ;;  %3006 = vmatmul.bf16.vlgmr.msra.gmra.mxu1 %v161_v17  ;;  %v4911_v10 = vld [vmem:[%s6193_s1 + $0x6f0] sm:$0xff]  ;;  %v4901_v17 = vld [vmem:[%s6193_s1 + $0x6a0] sm:$0xff] }
  0xa5   :  { %3050 = vmatpush.bf16.msrb.mxu1 %v4864_v15  ;;  %v2812_v38 = vpop.f32.mrf.mxu2  ;;  %v4894_v15 = vld [vmem:[%s6193_s1 + $0x668] sm:$0xff] }
  0xa6   :  { %3038 = vmatpush.bf16.msrb.mxu0 %v4855_v18  ;;  %v2813_v40 = vadd.f32 %v2812_v38, %v2800_v37  ;;  %v2825_v42 = vpop.f32.mrf.mxu3  ;;  %v2788_v46 = vpop.f32.mrf.mxu0  ;;  %v4909_v18 = vld [vmem:[%s6193_s1 + $0x6e0] sm:$0xff]  ;;  %v4882_v38 = vld [vmem:[%s6193_s1 + $0x608] sm:$0xff] }
  0xa7   :  { %3064 = vmatpush.bf16.msrb.mxu2 %v4871_v19  ;;  %v4897_v46 = vld [vmem:[%s6193_s1 + $0x680] sm:$0xff] }
  0xa8   :  { %3077 = vmatpush.bf16.msrb.mxu3 %v4879_v20  ;;  %v5700_v45 = vadd.f32 %v2825_v42, %v2813_v40  ;;  %v4898_v40 = vld [vmem:[%s6193_s1 + $0x688] sm:$0xff] }
  0xa9   :  { %3051 = vmatpush.bf16.msrb.mxu1 %v4863_v21  ;;  %v2801_v49 = vpop.f32.mrf.mxu1  ;;  %v4893_v21 = vld [vmem:[%s6193_s1 + $0x660] sm:$0xff] }
  0xaa   :  { %3039 = vmatpush.bf16.msrb.mxu0 %v4854_v22  ;;  %v85_v49 = vld.sshfl [vmem:[#allocation1 + $0x10] sm:$0xff pattern:$0x73625140] }
  0xab   :  { %3065 = vmatpush.bf16.msrb.mxu2 %v4870_v23  ;;  %v4884_v23 = vld [vmem:[%s6193_s1 + $0x618] sm:$0xff] }
  0xac   :  { %3078 = vmatpush.bf16.msrb.mxu3 %v4878_v24 }
  0xad   :  { %3052 = vmatpush.bf16.msrb.mxu1 %v4862_v26  ;;  %v2814_v53 = vpop.f32.mrf.mxu2  ;;  %v4908_v26 = vld [vmem:[%s6193_s1 + $0x6d8] sm:$0xff] }
  0xae   :  { %3040 = vmatpush.bf16.msrb.mxu0 %v4853_v27  ;;  %v2827_v58 = vpop.f32.mrf.mxu3  ;;  %v4944_v53 = vld [vmem:[%s6193_s1 + $0x7f8] sm:$0xff] }
  0xaf   :  { %3066 = vmatpush.bf16.msrb.mxu2 %v4869_v28  ;;  %v4892_v28 = vld [vmem:[%s6193_s1 + $0x658] sm:$0xff] }
  0xb0   :  { %3079 = vmatpush.bf16.msrb.mxu3 %v4877_v29  ;;  %v4928_v58 = vld [vmem:[%s6193_s1 + $0x778] sm:$0xff] }
  0xb1   :  { %3053 = vmatpush.bf16.msrb.mxu1 %v4861_v32  ;;  %v4899_v32 = vld [vmem:[%s6193_s1 + $0x690] sm:$0xff] }
  0xb2   :  { %3041 = vmatpush.bf16.msrb.mxu0 %v4852_v33  ;;  %v4907_v33 = vld [vmem:[%s6193_s1 + $0x6d0] sm:$0xff] }
  0xb3   :  { %3067 = vmatpush.bf16.msrb.mxu2 %v4868_v35 }
  0xb4   :  { %3080 = vmatpush.bf16.msrb.mxu3 %v4876_v36  ;;  %v4891_v36 = vld [vmem:[%s6193_s1 + $0x650] sm:$0xff] }
  0xb5   :  { %3054 = vmatpush.bf16.msrb.mxu1 %v4860_v39  ;;  %v35_v39 = vld [vmem:[%s6192_s0 + $0x38] sm:$0xff] }
  0xb6   :  { %3042 = vmatpush.bf16.msrb.mxu0 %v4851_v41  ;;  %v4906_v41 = vld [vmem:[%s6193_s1 + $0x6c8] sm:$0xff]  ;;  %82 = vst [vmem:[#allocation1 + $0x20] ss:$4 sm:$0xff] %v35_v39  ;;  %v4952_v39 = vld [vmem:[%s6193_s1 + $0x838] sm:$0xff] }
  0xb7   :  { %3068 = vmatpush.bf16.msrb.mxu2 %v4867_v43  ;;  %v4890_v43 = vld [vmem:[%s6193_s1 + $0x648] sm:$0xff] }
  0xb8   :  { %3081 = vmatpush.bf16.msrb.mxu3 %v4875_v44 }
  0xb9   :  { %3055 = vmatpush.bf16.msrb.mxu1 %v4859_v47  ;;  %v4905_v47 = vld [vmem:[%s6193_s1 + $0x6c0] sm:$0xff] }
  0xba   :  { %3043 = vmatpush.bf16.msrb.mxu0 %v4850_v48  ;;  %v83_v48 = vld.sshfl [vmem:[#allocation1] sm:$0xff pattern:$0x73625140] }
  0xbb   :  { %3069 = vmatpush.bf16.msrb.mxu2 %v4866_v51  ;;  %v4936_v51 = vld [vmem:[%s6193_s1 + $0x7b8] sm:$0xff] }
  0xbc   :  { %3082 = vmatpush.bf16.msrb.mxu3 %v4874_v52  ;;  %v86_v52 = vld.sshfl [vmem:[#allocation1 + $0x18] sm:$0xff pattern:$0x73625140] }
  0xbd   :  { %3056 = vmatpush.bf16.msrb.mxu1 %v4858_v54  ;;  %v4889_v54 = vld [vmem:[%s6193_s1 + $0x640] sm:$0xff]  ;;  %v171_v59 = vpack.c.bf16 %v86_v52, %v86_v52  ;;  %v4975_v52 = vld [vmem:[%s6193_s1 + $0x8f0] sm:$0xff] }
  0xbe   :  { %3044 = vmatpush.bf16.msrb.mxu0 %v4849_v55  ;;  %v2838_v19 = vpop.f32.mrf.mxu0  ;;  %v84_v55 = vld.sshfl [vmem:[#allocation1 + $0x8] sm:$0xff pattern:$0x73625140] }
  0xbf   :  { %3070 = vmatpush.bf16.msrb.mxu2 %v4865_v56  ;;  %v2839_v20 = vadd.f32 %v2838_v19, %v5700_v45  ;;  %v4881_v45 = vld [vmem:[%s6193_s1 + $0x600] sm:$0xff]  ;;  %v168_v56 = vpack.c.bf16 %v83_v48, %v83_v48  ;;  %v169_v60 = vpack.c.bf16 %v84_v55, %v84_v55  ;;  %v4966_v55 = vld [vmem:[%s6193_s1 + $0x8a8] sm:$0xff] }
  0xc0   :  { %3083 = vmatpush.bf16.msrb.mxu3 %v4873_v57  ;;  %v170_v57 = vpack.c.bf16 %v85_v49, %v85_v49 }
  0xc1   :  { %3057 = vmatpush.bf16.msrb.mxu1 %v4857_v1  ;;  %3045 = vmatmul.bf16.vlgmr.msrb.gmra.mxu0 %v164_v3  ;;  %v2851_v22 = vpop.f32.mrf.mxu1  ;;  %v4918_v1 = vld [vmem:[%s6193_s1 + $0x728] sm:$0xff] }
  0xc2   :  { %3089 = vmatpush.bf16.msra.mxu0 %v4888_v61  ;;  %3071 = vmatmul.bf16.vlgmr.msrb.gmra.mxu2 %v166_v4  ;;  %v2852_v24 = vadd.f32 %v2851_v22, %v2839_v20  ;;  %v4919_v61 = vld [vmem:[%s6193_s1 + $0x730] sm:$0xff]  ;;  %v4942_v3 = vld [vmem:[%s6193_s1 + $0x7e8] sm:$0xff] }
  0xc3   :  { %3115 = vmatpush.bf16.msra.mxu2 %v4904_v62  ;;  %3084 = vmatmul.bf16.vlgmr.msrb.gmra.mxu3 %v167_v6  ;;  %v4935_v62 = vld [vmem:[%s6193_s1 + $0x7b0] sm:$0xff]  ;;  %v4926_v4 = vld [vmem:[%s6193_s1 + $0x768] sm:$0xff] }
  0xc4   :  { %3128 = vmatpush.bf16.msra.mxu3 %v4912_v0  ;;  %3058 = vmatmul.bf16.vlgmr.msrb.gmra.mxu1 %v165_v7  ;;  %v4927_v0 = vld [vmem:[%s6193_s1 + $0x770] sm:$0xff]  ;;  %v4917_v7 = vld [vmem:[%s6193_s1 + $0x720] sm:$0xff] }
  0xc5   :  { %3102 = vmatpush.bf16.msra.mxu1 %v4896_v5  ;;  %v2864_v27 = vpop.f32.mrf.mxu2 }
  0xc6   :  { %3090 = vmatpush.bf16.msra.mxu0 %v4887_v8  ;;  %v2865_v29 = vadd.f32 %v2864_v27, %v2852_v24  ;;  %v2877_v30 = vpop.f32.mrf.mxu3  ;;  %v2840_v35 = vpop.f32.mrf.mxu0  ;;  %v4933_v8 = vld [vmem:[%s6193_s1 + $0x7a0] sm:$0xff]  ;;  %v4939_v24 = vld [vmem:[%s6193_s1 + $0x7d0] sm:$0xff]  ;;  %v4914_v27 = vld [vmem:[%s6193_s1 + $0x708] sm:$0xff] }
  0xc7   :  { %3116 = vmatpush.bf16.msra.mxu2 %v4903_v9  ;;  %v4941_v9 = vld [vmem:[%s6193_s1 + $0x7e0] sm:$0xff] }
  0xc8   :  { %3129 = vmatpush.bf16.msra.mxu3 %v4911_v10  ;;  %v5802_v34 = vadd.f32 %v2877_v30, %v2865_v29  ;;  %v4930_v29 = vld [vmem:[%s6193_s1 + $0x788] sm:$0xff]  ;;  %v4929_v35 = vld [vmem:[%s6193_s1 + $0x780] sm:$0xff] }
  0xc9   :  { %3103 = vmatpush.bf16.msra.mxu1 %v4895_v11  ;;  %v2853_v37 = vpop.f32.mrf.mxu1  ;;  %v4938_v30 = vld [vmem:[%s6193_s1 + $0x7c8] sm:$0xff] }
  0xca   :  { %3091 = vmatpush.bf16.msra.mxu0 %v4886_v12  ;;  %v4925_v12 = vld [vmem:[%s6193_s1 + $0x760] sm:$0xff] }
  0xcb   :  { %3117 = vmatpush.bf16.msra.mxu2 %v4902_v13  ;;  %v4916_v13 = vld [vmem:[%s6193_s1 + $0x718] sm:$0xff]  ;;  %v87_v37 = vld.sshfl [vmem:[#allocation1 + $0x20] sm:$0xff pattern:$0x73625140] }
  0xcc   :  { %3130 = vmatpush.bf16.msra.mxu3 %v4910_v14  ;;  %v4932_v14 = vld [vmem:[%s6193_s1 + $0x798] sm:$0xff] }
  0xcd   :  { %3104 = vmatpush.bf16.msra.mxu1 %v4894_v15  ;;  %v2866_v42 = vpop.f32.mrf.mxu2  ;;  %v4940_v15 = vld [vmem:[%s6193_s1 + $0x7d8] sm:$0xff] }
  0xce   :  { %3092 = vmatpush.bf16.msra.mxu0 %v4885_v16  ;;  %v2879_v44 = vpop.f32.mrf.mxu3  ;;  %v4976_v42 = vld [vmem:[%s6193_s1 + $0x8f8] sm:$0xff] }
  0xcf   :  { %3118 = vmatpush.bf16.msra.mxu2 %v4901_v17  ;;  %v88_v44 = vld.sshfl [vmem:[#allocation1 + $0x28] sm:$0xff pattern:$0x73625140] }
  0xd0   :  { %3131 = vmatpush.bf16.msra.mxu3 %v4909_v18  ;;  %v4924_v18 = vld [vmem:[%s6193_s1 + $0x758] sm:$0xff]  ;;  %v173_v49 = vpack.c.bf16 %v88_v44, %v88_v44  ;;  %v4998_v44 = vld [vmem:[%s6193_s1 + $0x9a8] sm:$0xff] }
  0xd1   :  { %3105 = vmatpush.bf16.msra.mxu1 %v4893_v21  ;;  %v4915_v21 = vld [vmem:[%s6193_s1 + $0x710] sm:$0xff] }
  0xd2   :  { %3093 = vmatpush.bf16.msra.mxu0 %v4884_v23  ;;  %v4931_v23 = vld [vmem:[%s6193_s1 + $0x790] sm:$0xff] }
  0xd3   :  { %3119 = vmatpush.bf16.msra.mxu2 %v4900_v25 }
  0xd4   :  { %3132 = vmatpush.bf16.msra.mxu3 %v4908_v26  ;;  %v4923_v26 = vld [vmem:[%s6193_s1 + $0x750] sm:$0xff] }
  0xd5   :  { %3106 = vmatpush.bf16.msra.mxu1 %v4892_v28  ;;  %v36_v28 = vld [vmem:[%s6192_s0 + $0x40] sm:$0xff] }
  0xd6   :  { %3094 = vmatpush.bf16.msra.mxu0 %v4883_v31  ;;  %91 = vst [vmem:[#allocation1] ss:$4 sm:$0xff] %v36_v28  ;;  %v4984_v28 = vld [vmem:[%s6193_s1 + $0x938] sm:$0xff] }
  0xd7   :  { %3120 = vmatpush.bf16.msra.mxu2 %v4899_v32  ;;  %v4922_v32 = vld [vmem:[%s6193_s1 + $0x748] sm:$0xff] }
  0xd8   :  { %3133 = vmatpush.bf16.msra.mxu3 %v4907_v33 }
  0xd9   :  { %3107 = vmatpush.bf16.msra.mxu1 %v4891_v36  ;;  %v4937_v36 = vld [vmem:[%s6193_s1 + $0x7c0] sm:$0xff] }
  0xda   :  { %3095 = vmatpush.bf16.msra.mxu0 %v4882_v38  ;;  %v89_v38 = vld.sshfl [vmem:[#allocation1 + $0x30] sm:$0xff pattern:$0x73625140] }
  0xdb   :  { %3121 = vmatpush.bf16.msra.mxu2 %v4898_v40  ;;  %v4968_v40 = vld [vmem:[%s6193_s1 + $0x8b8] sm:$0xff] }
  0xdc   :  { %3134 = vmatpush.bf16.msra.mxu3 %v4906_v41  ;;  %v90_v41 = vld.sshfl [vmem:[#allocation1 + $0x38] sm:$0xff pattern:$0x73625140] }
  0xdd   :  { %3108 = vmatpush.bf16.msra.mxu1 %v4890_v43  ;;  %v4921_v43 = vld [vmem:[%s6193_s1 + $0x740] sm:$0xff]  ;;  %v175_v48 = vpack.c.bf16 %v90_v41, %v90_v41  ;;  %v5007_v41 = vld [vmem:[%s6193_s1 + $0x9f0] sm:$0xff] }
  0xde   :  { %3096 = vmatpush.bf16.msra.mxu0 %v4881_v45  ;;  %v2890_v5 = vpop.f32.mrf.mxu0  ;;  %v172_v45 = vpack.c.bf16 %v87_v37, %v87_v37 }
  0xdf   :  { %3122 = vmatpush.bf16.msra.mxu2 %v4897_v46  ;;  %v2891_v6 = vadd.f32 %v2890_v5, %v5802_v34  ;;  %v4913_v34 = vld [vmem:[%s6193_s1 + $0x700] sm:$0xff]  ;;  %v174_v46 = vpack.c.bf16 %v89_v38, %v89_v38 }
  0xe0   :  { %3135 = vmatpush.bf16.msra.mxu3 %v4905_v47  ;;  %v4960_v47 = vld [vmem:[%s6193_s1 + $0x878] sm:$0xff] }
  0xe1   :  { %3109 = vmatpush.bf16.msra.mxu1 %v4889_v54  ;;  %3097 = vmatmul.bf16.vlgmr.msra.gmra.mxu0 %v168_v56  ;;  %v2903_v10 = vpop.f32.mrf.mxu1  ;;  %v4950_v54 = vld [vmem:[%s6193_s1 + $0x828] sm:$0xff] }
  0xe2   :  { %3141 = vmatpush.bf16.msrb.mxu0 %v4920_v50  ;;  %3123 = vmatmul.bf16.vlgmr.msra.gmra.mxu2 %v170_v57  ;;  %v2904_v11 = vadd.f32 %v2903_v10, %v2891_v6  ;;  %v4951_v50 = vld [vmem:[%s6193_s1 + $0x830] sm:$0xff]  ;;  %v4974_v56 = vld [vmem:[%s6193_s1 + $0x8e8] sm:$0xff] }
  0xe3   :  { %3167 = vmatpush.bf16.msrb.mxu2 %v4936_v51  ;;  %3136 = vmatmul.bf16.vlgmr.msra.gmra.mxu3 %v171_v59  ;;  %v4967_v51 = vld [vmem:[%s6193_s1 + $0x8b0] sm:$0xff]  ;;  %v4958_v57 = vld [vmem:[%s6193_s1 + $0x868] sm:$0xff] }
  0xe4   :  { %3180 = vmatpush.bf16.msrb.mxu3 %v4944_v53  ;;  %3110 = vmatmul.bf16.vlgmr.msra.gmra.mxu1 %v169_v60  ;;  %v4959_v53 = vld [vmem:[%s6193_s1 + $0x870] sm:$0xff]  ;;  %v4949_v60 = vld [vmem:[%s6193_s1 + $0x820] sm:$0xff] }
  0xe5   :  { %3154 = vmatpush.bf16.msrb.mxu1 %v4928_v58  ;;  %v2916_v16 = vpop.f32.mrf.mxu2 }
  0xe6   :  { %3142 = vmatpush.bf16.msrb.mxu0 %v4919_v61  ;;  %v2917_v17 = vadd.f32 %v2916_v16, %v2904_v11  ;;  %v2929_v19 = vpop.f32.mrf.mxu3  ;;  %v2892_v20 = vpop.f32.mrf.mxu0  ;;  %v4965_v61 = vld [vmem:[%s6193_s1 + $0x8a0] sm:$0xff]  ;;  %v4947_v11 = vld [vmem:[%s6193_s1 + $0x810] sm:$0xff]  ;;  %v37_v16 = vld [vmem:[%s6192_s0 + $0x48] sm:$0xff] }
  0xe7   :  { %3168 = vmatpush.bf16.msrb.mxu2 %v4935_v62  ;;  %v4973_v62 = vld [vmem:[%s6193_s1 + $0x8e0] sm:$0xff]  ;;  %92 = vst [vmem:[#allocation1 + $0x20] ss:$4 sm:$0xff] %v37_v16 }
  0xe8   :  { %3181 = vmatpush.bf16.msrb.mxu3 %v4943_v63  ;;  %v5898_v22 = vadd.f32 %v2929_v19, %v2917_v17  ;;  %v4946_v17 = vld [vmem:[%s6193_s1 + $0x808] sm:$0xff]  ;;  %v4993_v16 = vld [vmem:[%s6193_s1 + $0x980] sm:$0xff] }
  0xe9   :  { %3155 = vmatpush.bf16.msrb.mxu1 %v4927_v0  ;;  %v2905_v25 = vpop.f32.mrf.mxu1  ;;  %v4970_v19 = vld [vmem:[%s6193_s1 + $0x8c8] sm:$0xff] }
  0xea   :  { %3143 = vmatpush.bf16.msrb.mxu0 %v4918_v1  ;;  %v4957_v1 = vld [vmem:[%s6193_s1 + $0x860] sm:$0xff] }
  0xeb   :  { %3169 = vmatpush.bf16.msrb.mxu2 %v4934_v2  ;;  %v4948_v2 = vld [vmem:[%s6193_s1 + $0x818] sm:$0xff]  ;;  %v4969_v25 = vld [vmem:[%s6193_s1 + $0x8c0] sm:$0xff] }
  0xec   :  { %3182 = vmatpush.bf16.msrb.mxu3 %v4942_v3  ;;  %v4964_v3 = vld [vmem:[%s6193_s1 + $0x898] sm:$0xff] }
  0xed   :  { %3156 = vmatpush.bf16.msrb.mxu1 %v4926_v4  ;;  %v2918_v31 = vpop.f32.mrf.mxu2  ;;  %v4972_v4 = vld [vmem:[%s6193_s1 + $0x8d8] sm:$0xff] }
  0xee   :  { %3144 = vmatpush.bf16.msrb.mxu0 %v4917_v7  ;;  %v2931_v33 = vpop.f32.mrf.mxu3  ;;  %v5008_v31 = vld [vmem:[%s6193_s1 + $0x9f8] sm:$0xff] }
  0xef   :  { %3170 = vmatpush.bf16.msrb.mxu2 %v4933_v8  ;;  %v4956_v8 = vld [vmem:[%s6193_s1 + $0x858] sm:$0xff]  ;;  %v94_v33 = vld.sshfl [vmem:[#allocation1 + $0x8] sm:$0xff pattern:$0x73625140] }
  0xf0   :  { %3183 = vmatpush.bf16.msrb.mxu3 %v4941_v9  ;;  %v177_v38 = vpack.c.bf16 %v94_v33, %v94_v33 }
  0xf1   :  { %3157 = vmatpush.bf16.msrb.mxu1 %v4925_v12  ;;  %v4963_v12 = vld [vmem:[%s6193_s1 + $0x890] sm:$0xff] }
  0xf2   :  { %3145 = vmatpush.bf16.msrb.mxu0 %v4916_v13  ;;  %v4971_v13 = vld [vmem:[%s6193_s1 + $0x8d0] sm:$0xff] }
  0xf3   :  { %3171 = vmatpush.bf16.msrb.mxu2 %v4932_v14 }
  0xf4   :  { %3184 = vmatpush.bf16.msrb.mxu3 %v4940_v15  ;;  %v4955_v15 = vld [vmem:[%s6193_s1 + $0x850] sm:$0xff] }
  0xf5   :  { %3158 = vmatpush.bf16.msrb.mxu1 %v4924_v18  ;;  %v4962_v18 = vld [vmem:[%s6193_s1 + $0x888] sm:$0xff] }
  0xf6   :  { %3146 = vmatpush.bf16.msrb.mxu0 %v4915_v21 }
  0xf7   :  { %3172 = vmatpush.bf16.msrb.mxu2 %v4931_v23  ;;  %v4945_v23 = vld [vmem:[%s6193_s1 + $0x800] sm:$0xff] }
  0xf8   :  { %3185 = vmatpush.bf16.msrb.mxu3 %v4939_v24  ;;  %v4961_v24 = vld [vmem:[%s6193_s1 + $0x880] sm:$0xff] }
  0xf9   :  { %3159 = vmatpush.bf16.msrb.mxu1 %v4923_v26  ;;  %v93_v26 = vld.sshfl [vmem:[#allocation1] sm:$0xff pattern:$0x73625140] }
  0xfa   :  { %3147 = vmatpush.bf16.msrb.mxu0 %v4914_v27  ;;  %v95_v27 = vld.sshfl [vmem:[#allocation1 + $0x10] sm:$0xff pattern:$0x73625140] }
  0xfb   :  { %3173 = vmatpush.bf16.msrb.mxu2 %v4930_v29  ;;  %v5000_v29 = vld [vmem:[%s6193_s1 + $0x9b8] sm:$0xff] }
  0xfc   :  { %3186 = vmatpush.bf16.msrb.mxu3 %v4938_v30  ;;  %v96_v30 = vld.sshfl [vmem:[#allocation1 + $0x18] sm:$0xff pattern:$0x73625140] }
  0xfd   :  { %3160 = vmatpush.bf16.msrb.mxu1 %v4922_v32  ;;  %v4953_v32 = vld [vmem:[%s6193_s1 + $0x840] sm:$0xff]  ;;  %v179_v37 = vpack.c.bf16 %v96_v30, %v96_v30 }
  0xfe   :  { %3148 = vmatpush.bf16.msrb.mxu0 %v4913_v34  ;;  %v2942_v58 = vpop.f32.mrf.mxu0  ;;  %v176_v34 = vpack.c.bf16 %v93_v26, %v93_v26 }
  0xff   :  { %3174 = vmatpush.bf16.msrb.mxu2 %v4929_v35  ;;  %v2943_v59 = vadd.f32 %v2942_v58, %v5898_v22  ;;  %v4954_v22 = vld [vmem:[%s6193_s1 + $0x848] sm:$0xff]  ;;  %v178_v35 = vpack.c.bf16 %v95_v27, %v95_v27  ;;  %v5004_v58 = vld [vmem:[%s6193_s1 + $0x9d8] sm:$0xff] }
 0x100   :  { %3187 = vmatpush.bf16.msrb.mxu3 %v4937_v36  ;;  %v4992_v36 = vld [vmem:[%s6193_s1 + $0x978] sm:$0xff] }
 0x101   :  { %3161 = vmatpush.bf16.msrb.mxu1 %v4921_v43  ;;  %3149 = vmatmul.bf16.vlgmr.msrb.gmra.mxu0 %v172_v45  ;;  %v2955_v63 = vpop.f32.mrf.mxu1  ;;  %v4982_v43 = vld [vmem:[%s6193_s1 + $0x928] sm:$0xff] }
 0x102   :  { %3193 = vmatpush.bf16.msra.mxu0 %v4952_v39  ;;  %3175 = vmatmul.bf16.vlgmr.msrb.gmra.mxu2 %v174_v46  ;;  %v2956_v0 = vadd.f32 %v2955_v63, %v2943_v59  ;;  %v4983_v39 = vld [vmem:[%s6193_s1 + $0x930] sm:$0xff]  ;;  %v5006_v45 = vld [vmem:[%s6193_s1 + $0x9e8] sm:$0xff] }
 0x103   :  { %3219 = vmatpush.bf16.msra.mxu2 %v4968_v40  ;;  %3188 = vmatmul.bf16.vlgmr.msrb.gmra.mxu3 %v175_v48  ;;  %v4999_v40 = vld [vmem:[%s6193_s1 + $0x9b0] sm:$0xff] }
 0x104   :  { %3232 = vmatpush.bf16.msra.mxu3 %v4976_v42  ;;  %3162 = vmatmul.bf16.vlgmr.msrb.gmra.mxu1 %v173_v49  ;;  %v4991_v42 = vld [vmem:[%s6193_s1 + $0x970] sm:$0xff] }
 0x105   :  { %3206 = vmatpush.bf16.msra.mxu1 %v4960_v47  ;;  %v2968_v5 = vpop.f32.mrf.mxu2  ;;  %v38_v46 = vld [vmem:[%s6192_s0 + $0x50] sm:$0x3]  ;;  %v4990_v47 = vld [vmem:[%s6193_s1 + $0x968] sm:$0xff] }
 0x106   :  { %3194 = vmatpush.bf16.msra.mxu0 %v4951_v50  ;;  %v2969_v6 = vadd.f32 %v2968_v5, %v2956_v0  ;;  %v2981_v7 = vpop.f32.mrf.mxu3  ;;  %v2944_v9 = vpop.f32.mrf.mxu0  ;;  %101 = vst [vmem:[#allocation1] ss:$4 sm:$0xff] %v38_v46  ;;  %v4981_v50 = vld [vmem:[%s6193_s1 + $0x920] sm:$0xff] }
 0x107   :  { %3220 = vmatpush.bf16.msra.mxu2 %v4967_v51  ;;  %v4997_v51 = vld [vmem:[%s6193_s1 + $0x9a0] sm:$0xff]  ;;  %v4994_v9 = vld [vmem:[%s6193_s1 + $0x988] sm:$0xff] }
 0x108   :  { %3233 = vmatpush.bf16.msra.mxu3 %v4975_v52  ;;  %v5997_v10 = vadd.f32 %v2981_v7, %v2969_v6  ;;  %v5005_v52 = vld [vmem:[%s6193_s1 + $0x9e0] sm:$0xff]  ;;  %v4987_v6 = vld [vmem:[%s6193_s1 + $0x950] sm:$0xff] }
 0x109   :  { %3207 = vmatpush.bf16.msra.mxu1 %v4959_v53  ;;  %v2957_v14 = vpop.f32.mrf.mxu1 }
 0x10a   :  { %3195 = vmatpush.bf16.msra.mxu0 %v4950_v54  ;;  %v4977_v14 = vld [vmem:[%s6193_s1 + $0x900] sm:$0xff] }
 0x10b   :  { %3221 = vmatpush.bf16.msra.mxu2 %v4966_v55  ;;  %v4989_v55 = vld [vmem:[%s6193_s1 + $0x960] sm:$0xff] }
 0x10c   :  { %3234 = vmatpush.bf16.msra.mxu3 %v4974_v56  ;;  %v4980_v56 = vld [vmem:[%s6193_s1 + $0x918] sm:$0xff] }
 0x10d   :  { %3208 = vmatpush.bf16.msra.mxu1 %v4958_v57  ;;  %v2970_v20 = vpop.f32.mrf.mxu2  ;;  %v4996_v57 = vld [vmem:[%s6193_s1 + $0x998] sm:$0xff] }
 0x10e   :  { %3196 = vmatpush.bf16.msra.mxu0 %v4949_v60  ;;  %v2983_v21 = vpop.f32.mrf.mxu3  ;;  %v100_v20 = vld.sshfl [vmem:[#allocation1 + $0x38] sm:$0xff pattern:$0x73625140] }
 0x10f   :  { %3222 = vmatpush.bf16.msra.mxu2 %v4965_v61  ;;  %v4985_v21 = vld [vmem:[%s6193_s1 + $0x940] sm:$0xff]  ;;  %v183_v26 = vpack.c.bf16 %v100_v20, %v100_v20  ;;  %v3351_v20 = vld [vmem:[%s6197_s5 + $0x18] sm:$0xff] }
 0x110   :  { %3235 = vmatpush.bf16.msra.mxu3 %v4973_v62  ;;  %v4988_v62 = vld [vmem:[%s6193_s1 + $0x958] sm:$0xff] }
 0x111   :  { %3209 = vmatpush.bf16.msra.mxu1 %v4957_v1  ;;  %v4979_v1 = vld [vmem:[%s6193_s1 + $0x910] sm:$0xff] }
 0x112   :  { %3197 = vmatpush.bf16.msra.mxu0 %v4948_v2  ;;  %v829_v2 = vld [vmem:[%s6193_s1 + $0xa10] sm:$0xf] }
 0x113   :  { %3223 = vmatpush.bf16.msra.mxu2 %v4964_v3  ;;  %v4995_v3 = vld [vmem:[%s6193_s1 + $0x990] sm:$0xff]  ;;  %v2123_v7 = vunpack.c.l.b16 %v829_v2 }
 0x114   :  { %3236 = vmatpush.bf16.msra.mxu3 %v4972_v4  ;;  %v5003_v4 = vld [vmem:[%s6193_s1 + $0x9d0] sm:$0xff] }
 0x115   :  { %3210 = vmatpush.bf16.msra.mxu1 %v4956_v8  ;;  %v4978_v8 = vld [vmem:[%s6193_s1 + $0x908] sm:$0xff] }
 0x116   :  { %3198 = vmatpush.bf16.msra.mxu0 %v4947_v11 }
 0x117   :  { %3224 = vmatpush.bf16.msra.mxu2 %v4963_v12 }
 0x118   :  { %3237 = vmatpush.bf16.msra.mxu3 %v4971_v13  ;;  %v4986_v13 = vld [vmem:[%s6193_s1 + $0x948] sm:$0xff] }
 0x119   :  { %3211 = vmatpush.bf16.msra.mxu1 %v4955_v15  ;;  %v2446_v15 = vpack.c.b16 %v2123_v7, %v2123_v7 }
 0x11a   :  { %3199 = vmatpush.bf16.msra.mxu0 %v4946_v17  ;;  %v5001_v17 = vld [vmem:[%s6193_s1 + $0x9c0] sm:$0xff] }
 0x11b   :  { %3225 = vmatpush.bf16.msra.mxu2 %v4962_v18  ;;  %v97_v18 = vld.sshfl [vmem:[#allocation1 + $0x20] sm:$0xff pattern:$0x73625140] }
 0x11c   :  { %3238 = vmatpush.bf16.msra.mxu3 %v4970_v19  ;;  %v99_v19 = vld.sshfl [vmem:[#allocation1 + $0x30] sm:$0xff pattern:$0x73625140] }
 0x11d   :  { %3212 = vmatpush.bf16.msra.mxu1 %v4954_v22  ;;  %v180_v22 = vpack.c.bf16 %v97_v18, %v97_v18  ;;  %v3311_v18 = vld [vmem:[%s6195_s3] sm:$0xff] }
 0x11e   :  { %3200 = vmatpush.bf16.msra.mxu0 %v4945_v23  ;;  %v2994_v48 = vpop.f32.mrf.mxu0  ;;  %v2775_v23 = vsel %vm2773_vm0, %v2446_v15, 0 }
 0x11f   :  { %3226 = vmatpush.bf16.msra.mxu2 %v4961_v24  ;;  %v2995_v49 = vadd.f32 %v2994_v48, %v5997_v10  ;;  %v5002_v10 = vld [vmem:[%s6193_s1 + $0x9c8] sm:$0xff] }
 0x120   :  { %3239 = vmatpush.bf16.msra.mxu3 %v4969_v25  ;;  %v98_v24 = vld.sshfl [vmem:[#allocation1 + $0x28] sm:$0xff pattern:$0x73625140]  ;;  %v182_v25 = vpack.c.bf16 %v99_v19, %v99_v19 }
 0x121   :  { %3213 = vmatpush.bf16.msra.mxu1 %v4953_v32  ;;  %3201 = vmatmul.bf16.vlgmr.msra.gmra.mxu0 %v176_v34  ;;  %v3007_v53 = vpop.f32.mrf.mxu1  ;;  %v181_v27 = vpack.c.bf16 %v98_v24, %v98_v24  ;;  %v102_v34 = vld.sshfl [vmem:[#allocation1] sm:$0xff pattern:$0x73625140] }
 0x122   :  { %3245 = vmatpush.bf16.msrb.mxu0 %v4984_v28  ;;  %3227 = vmatmul.bf16.vlgmr.msra.gmra.mxu2 %v178_v35  ;;  %v3008_v54 = vadd.f32 %v3007_v53, %v2995_v49  ;;  %v5010_v28 = vld [vmem:[%s6193_s1 + $0xa08] sm:$0xff] }
 0x123   :  { %3271 = vmatpush.bf16.msrb.mxu2 %v5000_v29  ;;  %3240 = vmatmul.bf16.vlgmr.msra.gmra.mxu3 %v179_v37  ;;  %v5009_v29 = vld [vmem:[%s6193_s1 + $0xa00] sm:$0xff] }
 0x124   :  { %3284 = vmatpush.bf16.msrb.mxu3 %v5008_v31  ;;  %3214 = vmatmul.bf16.vlgmr.msra.gmra.mxu1 %v177_v38 }
 0x125   :  { %3258 = vmatpush.bf16.msrb.mxu1 %v4992_v36  ;;  %v3020_v59 = vpop.f32.mrf.mxu2  ;;  %v184_v36 = vpack.c.bf16 %v102_v34, %v102_v34 }
 0x126   :  { %3246 = vmatpush.bf16.msrb.mxu0 %v4983_v39  ;;  %v3021_v60 = vadd.f32 %v3020_v59, %v3008_v54  ;;  %v3033_v61 = vpop.f32.mrf.mxu3  ;;  %v2996_v63 = vpop.f32.mrf.mxu0 }
 0x127   :  { %3272 = vmatpush.bf16.msrb.mxu2 %v4999_v40 }
 0x128   :  { %3285 = vmatpush.bf16.msrb.mxu3 %v5007_v41  ;;  %v3034_v0 = vadd.f32 %v3033_v61, %v3021_v60 }
 0x129   :  { %3259 = vmatpush.bf16.msrb.mxu1 %v4991_v42  ;;  %v3009_v5 = vpop.f32.mrf.mxu1 }
 0x12a   :  { %3247 = vmatpush.bf16.msrb.mxu0 %v4982_v43 }
 0x12b   :  { %3273 = vmatpush.bf16.msrb.mxu2 %v4998_v44 }
 0x12c   :  { %3286 = vmatpush.bf16.msrb.mxu3 %v5006_v45 }
 0x12d   :  { %3260 = vmatpush.bf16.msrb.mxu1 %v4990_v47  ;;  %v3022_v11 = vpop.f32.mrf.mxu2 }
 0x12e   :  { %3248 = vmatpush.bf16.msrb.mxu0 %v4981_v50  ;;  %v3035_v12 = vpop.f32.mrf.mxu3 }
 0x12f   :  { %3274 = vmatpush.bf16.msrb.mxu2 %v4997_v51  ;;  %v3313_v12 = vld [vmem:[%s6195_s3 + $0x10] sm:$0xff] }
 0x130   :  { %3287 = vmatpush.bf16.msrb.mxu3 %v5005_v52 }
 0x131   :  { %3261 = vmatpush.bf16.msrb.mxu1 %v4989_v55 }
 0x132   :  { %3249 = vmatpush.bf16.msrb.mxu0 %v4980_v56 }
 0x133   :  { %3275 = vmatpush.bf16.msrb.mxu2 %v4996_v57 }
 0x134   :  { %3288 = vmatpush.bf16.msrb.mxu3 %v5004_v58 }
 0x135   :  { %3262 = vmatpush.bf16.msrb.mxu1 %v4988_v62 }
 0x136   :  { %3250 = vmatpush.bf16.msrb.mxu0 %v4979_v1  ;;  %v3318_v1 = vld [vmem:[%s6195_s3 + $0x38] sm:$0xff] }
 0x137   :  { %3276 = vmatpush.bf16.msrb.mxu2 %v4995_v3  ;;  %v3317_v3 = vld [vmem:[%s6195_s3 + $0x30] sm:$0xff] }
 0x138   :  { %3289 = vmatpush.bf16.msrb.mxu3 %v5003_v4 }
 0x139   :  { %3263 = vmatpush.bf16.msrb.mxu1 %v4987_v6  ;;  %v3316_v6 = vld [vmem:[%s6195_s3 + $0x28] sm:$0xff] }
 0x13a   :  { %3251 = vmatpush.bf16.msrb.mxu0 %v4978_v8  ;;  %v3315_v8 = vld [vmem:[%s6195_s3 + $0x20] sm:$0xff] }
 0x13b   :  { %3277 = vmatpush.bf16.msrb.mxu2 %v4994_v9  ;;  %v3314_v9 = vld [vmem:[%s6195_s3 + $0x18] sm:$0xff] }
 0x13c   :  { %3290 = vmatpush.bf16.msrb.mxu3 %v5002_v10 }
 0x13d   :  { %3264 = vmatpush.bf16.msrb.mxu1 %v4986_v13 }
 0x13e   :  { %3252 = vmatpush.bf16.msrb.mxu0 %v4977_v14  ;;  %v3046_v30 = vpop.f32.mrf.mxu0 }
 0x13f   :  { %3278 = vmatpush.bf16.msrb.mxu2 %v4993_v16  ;;  %v3047_v31 = vadd.f32 %v3046_v30, %v3034_v0  ;;  %v3312_v16 = vld [vmem:[%s6195_s3 + $0x8] sm:$0xff] }
 0x140   :  { %3291 = vmatpush.bf16.msrb.mxu3 %v5001_v17 }
 0x141   :  { %3265 = vmatpush.bf16.msrb.mxu1 %v4985_v21  ;;  %3253 = vmatmul.bf16.vlgmr.msrb.gmra.mxu0 %v180_v22  ;;  %v3059_v32 = vpop.f32.mrf.mxu1  ;;  %v3350_v21 = vld [vmem:[%s6197_s5 + $0x10] sm:$0xff] }
 0x142   :  { %3302 = vmatpush.bf16.msra.mxu0 %v2775_v23  ;;  %3279 = vmatmul.bf16.vlgmr.msrb.gmra.mxu2 %v182_v25  ;;  %v3060_v33 = vadd.f32 %v3059_v32, %v3047_v31  ;;  %v3349_v23 = vld [vmem:[%s6197_s5 + $0x8] sm:$0xff] }
 0x143   :  { %3292 = vmatmul.bf16.vlgmr.msrb.gmra.mxu3 %v183_v26  ;;  %3372 = vmatpush.msra.mxu2 %v3351_v20 }
 0x144   :  { %3266 = vmatmul.bf16.vlgmr.msrb.gmra.mxu1 %v181_v27 }
 0x145   :  { %v3072_v35 = vpop.f32.mrf.mxu2  ;;  %3335 = vmatpush.msra.mxu1 %v3318_v1  ;;  %3373 = vmatpush.msra.mxu2 %v3350_v21 }
 0x146   :  { %3303 = vmatpush.bf16.msra.mxu0 %v5010_v28  ;;  %v3073_v37 = vadd.f32 %v3072_v35, %v3060_v33  ;;  %v3085_v38 = vpop.f32.mrf.mxu3  ;;  %v3048_v39 = vpop.f32.mrf.mxu0 }
 0x147   :  { %3336 = vmatpush.msra.mxu1 %v3317_v3  ;;  %3374 = vmatpush.msra.mxu2 %v3349_v23 }
 0x148   :  { %v3086_v40 = vadd.f32 %v3085_v38, %v3073_v37 }
 0x149   :  { %v3061_v41 = vpop.f32.mrf.mxu1  ;;  %3337 = vmatpush.msra.mxu1 %v3316_v6 }
 0x14a   :  { %3304 = vmatpush.bf16.msra.mxu0 %v5009_v29 }
 0x14b   :  { %3338 = vmatpush.msra.mxu1 %v3315_v8 }
 0x14d   :  { %v3074_v42 = vpop.f32.mrf.mxu2  ;;  %3339 = vmatpush.msra.mxu1 %v3314_v9 }
 0x14e   :  { %v3087_v43 = vpop.f32.mrf.mxu3 }
 0x14f   :  { %3340 = vmatpush.msra.mxu1 %v3313_v12  ;;  %v3348_v43 = vld [vmem:[%s6197_s5] sm:$0xff]  ;;  %s3389_s5 = sshll.u32 %s6199_s7, 4  ;;  %s3390_s5 = int_to_ptr.hbm [resolvable:$true] %s3389_s5 }
 0x150   :  { %3375 = vmatpush.msra.mxu2 %v3348_v43 }
 0x151   :  { %4686 = vmatmul.msk.bf16.vlgmr.msra.gmra.mxu0 %vm2769_vm1, %v184_v36  ;;  %3341 = vmatpush.msra.mxu1 %v3312_v16 }
 0x153   :  { %3342 = vmatpush.msra.mxu1 %v3311_v18 }
 0x15e   :  { %v3098_v44 = vpop.f32.mrf.mxu0 }
 0x15f   :  { %v3099_v45 = vadd.f32 %v3098_v44, %v3086_v40  ;;  %v5013_v44 = vld [vmem:[%s6196_s4] ss:$0 sm:$0xff] }
 0x161   :  { %v3111_v46 = vpop.f32.mrf.mxu1 }
 0x162   :  { %v3112_v47 = vadd.f32 %v3111_v46, %v3099_v45 }
 0x165   :  { %v3124_v48 = vpop.f32.mrf.mxu2 }
 0x166   :  { %v3125_v49 = vadd.f32 %v3124_v48, %v3112_v47  ;;  %v3137_v50 = vpop.f32.mrf.mxu3  ;;  %v3100_v51 = vpop.f32.mrf.mxu0  ;;  %v5014_v48 = vld [vmem:[%s6198_s6] ss:$0 sm:$0xff] }
 0x168   :  { %v3138_v52 = vadd.f32 %v3137_v50, %v3125_v49 }
 0x169   :  { %v3113_v53 = vpop.f32.mrf.mxu1 }
 0x16d   :  { %v3126_v54 = vpop.f32.mrf.mxu2 }
 0x16e   :  { %v3139_v55 = vpop.f32.mrf.mxu3 }
 0x17e   :  { %v3150_v56 = vpop.f32.mrf.mxu0 }
 0x17f   :  { %v3151_v10 = vadd.f32 %v3150_v56, %v3138_v52 }
 0x181   :  { %v3163_v57 = vpop.f32.mrf.mxu1 }
 0x182   :  { %v3164_v13 = vadd.f32 %v3163_v57, %v3151_v10 }
 0x185   :  { %v3176_v58 = vpop.f32.mrf.mxu2 }
 0x186   :  { %v3189_v59 = vpop.f32.mrf.mxu3  ;;  %v3152_v60 = vpop.f32.mrf.mxu0  ;;  %v3177_v17 = vadd.f32 %v3176_v58, %v3164_v13 }
 0x188   :  { %v3190_v19 = vadd.f32 %v3189_v59, %v3177_v17 }
 0x189   :  { %v3165_v61 = vpop.f32.mrf.mxu1 }
 0x18d   :  { %v3178_v62 = vpop.f32.mrf.mxu2 }
 0x18e   :  { %v3191_v63 = vpop.f32.mrf.mxu3 }
 0x19e   :  { %v3202_v0 = vpop.f32.mrf.mxu0 }
 0x19f   :  { %v3203_v22 = vadd.f32 %v3202_v0, %v3190_v19 }
 0x1a1   :  { %v3215_v2 = vpop.f32.mrf.mxu1 }
 0x1a2   :  { %v3216_v24 = vadd.f32 %v3215_v2, %v3203_v22 }
 0x1a5   :  { %v3228_v4 = vpop.f32.mrf.mxu2 }
 0x1a6   :  { %v3241_v5 = vpop.f32.mrf.mxu3  ;;  %v3204_v7 = vpop.f32.mrf.mxu0  ;;  %v3229_v25 = vadd.f32 %v3228_v4, %v3216_v24 }
 0x1a8   :  { %v3242_v27 = vadd.f32 %v3241_v5, %v3229_v25 }
 0x1a9   :  { %v3217_v11 = vpop.f32.mrf.mxu1 }
 0x1ad   :  { %v3230_v14 = vpop.f32.mrf.mxu2 }
 0x1ae   :  { %v3243_v15 = vpop.f32.mrf.mxu3 }
 0x1be   :  { %v3254_v26 = vpop.f32.mrf.mxu0 }
 0x1bf   :  { %v3255_v29 = vadd.f32 %v3254_v26, %v3242_v27 }
 0x1c1   :  { %v3267_v28 = vpop.f32.mrf.mxu1 }
 0x1c2   :  { %v3268_v33 = vadd.f32 %v3267_v28, %v3255_v29 }
 0x1c5   :  { %v3280_v30 = vpop.f32.mrf.mxu2 }
 0x1c6   :  { %v3293_v31 = vpop.f32.mrf.mxu3  ;;  %v3256_v32 = vpop.f32.mrf.mxu0  ;;  %v3281_v34 = vadd.f32 %v3280_v30, %v3268_v33 }
 0x1c8   :  { %v3294_v36 = vadd.f32 %v3293_v31, %v3281_v34 }
 0x1c9   :  { %v3269_v35 = vpop.f32.mrf.mxu1 }
 0x1cd   :  { %v3282_v37 = vpop.f32.mrf.mxu2 }
 0x1ce   :  { %v3295_v38 = vpop.f32.mrf.mxu3  ;;  %v3306_v39 = vpop.f32.mrf.mxu0 }
 0x1cf   :  { %v3307_v40 = vadd.f32 %v3306_v39, %v3294_v36 }
 0x1d1   :  { %v3310_v41 = vmax.f32 %v3307_v40, 0.0 }
 0x1d3   :  { %4687 = vmatmul.msk.f32.vlgmr.msra.gmra.mxu1 %vm3323_vm2, %v3310_v41 }
 0x1d6   :  { %v3308_v42 = vpop.f32.mrf.mxu0 }
 0x250   :  { %v3344_v45 = vpop.f32.mrf.mxu1 }
 0x251   :  { %v3345_v46 = vadd.f32 %v5013_v44, %v3344_v45 }
 0x253   :  { %v3347_v47 = vmax.f32 %v3345_v46, 0.0 }
 0x255   :  { %4688 = vmatmul.msk.f32.vlgmr.msra.gmra.mxu2 %vm3356_vm3, %v3347_v47 }
 0x2d8   :  { %v3377_v49 = vpop.f32.mrf.mxu2 }
 0x2d9   :  { %v3378_v50 = vadd.f32 %v5014_v48, %v3377_v49 }
 0x2db   :  { %3381 = vst.msk [vmem:[#allocation2] sm:$0x3] %vm3380_vm4, %v3378_v50 }
 0x2dc   :  { %3392 = dma.vmem_to_hbm [thread:$0]  %s3388_s13, 32, %s3390_s5, [#allocation3]  }
 0x2dd   :  { %5039 = dma.done.wait [#allocation3], 32  }
 0x2de   :  { %5040 = vsyncadd [#allocation3], 4294967264 }
 0x2df   :  { %3397 = vsyncpa [#allocation3], 1 }

</bundles_post_ra>
